<compile_context>
chip_gen: v6e
topology: v6e:2x2x1
jax: 0.10.0
libtpu: 0.0.40
codegen_flags: <defaults>
</compile_context>

<pallas_src>
import functools

import jax
import jax.numpy as jnp
from jax.experimental import pallas as pl
from jax.experimental.pallas import tpu as pltpu


def mha_kernel(q_ref, k_ref, v_ref, wq_ref, wk_ref, wv_ref, wo_ref,
               ln_g_ref, ln_b_ref, out_ref, attn_ref, k_scr, v_scr,
               *, n_head, d_k, d_v):
    f32 = jnp.float32
    bf16 = jnp.bfloat16

    # --- Project K/V once per batch element (qi == 0); cache in VMEM scratch.
    # k_ref/v_ref and the weights are already bf16; accumulate in f32 on the MXU.
    @pl.when(pl.program_id(1) == 0)
    def _():
        k_scr[...] = jnp.dot(k_ref[0], wk_ref[...],
                             preferred_element_type=f32).astype(bf16)
        v_scr[...] = jnp.dot(v_ref[0], wv_ref[...],
                             preferred_element_type=f32).astype(bf16)

    residual = q_ref[0].astype(f32)                              # (TQ, D)

    # Q projection; the 1/sqrt(d_k) temperature is pre-folded into wq.
    q_all = jnp.dot(q_ref[0].astype(bf16), wq_ref[...],
                    preferred_element_type=f32)                  # (TQ, H*d_k)

    ctx_parts = []
    for h in range(n_head):                       # static loop, 128-aligned lane slices
        qh = q_all[:, h * d_k:(h + 1) * d_k].astype(bf16)        # (TQ, d_k)
        kh = k_scr[:, h * d_k:(h + 1) * d_k]                     # (Lk, d_k) bf16
        vh = v_scr[:, h * d_v:(h + 1) * d_v]                     # (Lk, d_v) bf16

        # q @ k^T without materializing a transpose (contract last dims).
        scores = jax.lax.dot_general(qh, kh, (((1,), (1,)), ((), ())),
                                     preferred_element_type=f32)  # (TQ, Lk)

        # Softmax in f32 (portable to v5e); reciprocal goes to the EUP slot.
        # (On v6e/v7x the exp could run in bf16 for ~2x EUP throughput.)
        m = jnp.max(scores, axis=-1, keepdims=True)
        ex = jnp.exp(scores - m)
        denom = jnp.sum(ex, axis=-1, keepdims=True)
        p = ex * pl.reciprocal(denom, approx=True)               # (TQ, Lk)

        # Attention-probs writeback in bf16 (dropout = identity in eval).
        attn_ref[0, h, :, :] = p.astype(attn_ref.dtype)

        ctx_parts.append(jnp.dot(p.astype(bf16), vh,
                                 preferred_element_type=f32))    # (TQ, d_v)

    # Heads already live in disjoint 128-aligned lane groups: concat is cheap.
    concat = jnp.concatenate([c.astype(bf16) for c in ctx_parts], axis=-1)
    proj = jnp.dot(concat, wo_ref[...], preferred_element_type=f32)   # (TQ, D)

    # Residual add + LayerNorm (eps = 1e-6); fc-dropout = identity in eval.
    y = proj + residual
    mean = jnp.mean(y, axis=-1, keepdims=True)
    var = jnp.mean((y - mean) ** 2, axis=-1, keepdims=True)
    y = (y - mean) * jax.lax.rsqrt(var + 1e-6)
    y = y * ln_g_ref[0].astype(f32) + ln_b_ref[0].astype(f32)

    out_ref[0] = y.astype(out_ref.dtype)


def _pick_query_tile(lq):
    # Biggest lane/sublane-friendly tile that divides Lq (amortizes per-step
    # overhead); fall back to a single block for odd lengths.
    for t in (512, 256, 128):
        if lq % t == 0:
            return t
    return lq  # note: single block => VMEM grows with Lq; fine at small shapes


def multi_head_attention(q, k, v, params, *, n_head, d_k, d_v):
    """params must come from prepare_params() (bf16 weights, scaled Wq)."""
    B, Lq, D = q.shape
    Lk = k.shape[1]
    assert k.shape == (B, Lk, D) and v.shape == (B, Lk, D)

    TQ = _pick_query_tile(Lq)
    NQ = Lq // TQ

    # K/V feed the MXU as bf16 anyway: ship them as bf16 (no-op if already bf16).
    k = k.astype(jnp.bfloat16)
    v = v.astype(jnp.bfloat16)

    wq, wk, wv, wo = params["wq"], params["wk"], params["wv"], params["wo"]
    ln_g, ln_b = params["ln_g"], params["ln_b"]

    kernel = functools.partial(mha_kernel, n_head=n_head, d_k=d_k, d_v=d_v)

    def full(arr):
        return pl.BlockSpec(arr.shape, lambda b, qi, _n=arr.ndim: (0,) * _n)

    out, attn = pl.pallas_call(
        kernel,
        out_shape=(
            jax.ShapeDtypeStruct((B, Lq, D), q.dtype),                 # output
            jax.ShapeDtypeStruct((B, n_head, Lq, Lk), jnp.bfloat16),   # attn probs
        ),
        grid=(B, NQ),
        in_specs=[
            pl.BlockSpec((1, TQ, D), lambda b, qi: (b, qi, 0)),   # q (query-tiled, f32)
            pl.BlockSpec((1, Lk, D), lambda b, qi: (b, 0, 0)),    # k (full length, bf16)
            pl.BlockSpec((1, Lk, D), lambda b, qi: (b, 0, 0)),    # v (full length, bf16)
            full(wq), full(wk), full(wv), full(wo),
            full(ln_g), full(ln_b),
        ],
        out_specs=(
            pl.BlockSpec((1, TQ, D), lambda b, qi: (b, qi, 0)),
            pl.BlockSpec((1, n_head, TQ, Lk), lambda b, qi: (b, 0, qi, 0)),
        ),
        scratch_shapes=[
            pltpu.VMEM((Lk, n_head * d_k), jnp.bfloat16),   # cached projected K
            pltpu.VMEM((Lk, n_head * d_v), jnp.bfloat16),   # cached projected V
        ],
        compiler_params=pltpu.CompilerParams(
            # qi must be "arbitrary": the qi==0 step fills the K/V cache and
            # later qi steps reuse it; B stays "parallel" for megacore.
            dimension_semantics=("parallel", "arbitrary"),
            vmem_limit_bytes=32 * 1024 * 1024,
        ),
    )(q, k, v, wq, wk, wv, wo, ln_g, ln_b)
    return out, attn


def make_params(key, d_model, n_head, d_k, d_v):
    ks = jax.random.split(key, 4)
    s = 0.1
    return {
        "wq": s * jax.random.normal(ks[0], (d_model, n_head * d_k), jnp.float32),
        "wk": s * jax.random.normal(ks[1], (d_model, n_head * d_k), jnp.float32),
        "wv": s * jax.random.normal(ks[2], (d_model, n_head * d_v), jnp.float32),
        "wo": s * jax.random.normal(ks[3], (n_head * d_v, d_model), jnp.float32),
        "ln_g": jnp.ones((1, d_model), jnp.float32),
        "ln_b": jnp.zeros((1, d_model), jnp.float32),
    }


def prepare_params(params, *, d_k):
    """One-time conversion to kernel dtypes (hoisted out of the per-call path).

    Also folds the 1/sqrt(d_k) attention temperature into Wq.
    """
    return {
        "wq": (params["wq"] * jnp.float32(1.0 / (d_k ** 0.5))).astype(jnp.bfloat16),
        "wk": params["wk"].astype(jnp.bfloat16),
        "wv": params["wv"].astype(jnp.bfloat16),
        "wo": params["wo"].astype(jnp.bfloat16),
        "ln_g": params["ln_g"].astype(jnp.float32),
        "ln_b": params["ln_b"].astype(jnp.float32),
    }


def mha_reference(q, k, v, params, *, n_head, d_k, d_v):
    """Pure-JAX f32 reference matching the PyTorch module (eval mode)."""
    B, Lq, D = q.shape
    Lk = k.shape[1]
    residual = q
    qp = (q @ params["wq"]).reshape(B, Lq, n_head, d_k).transpose(0, 2, 1, 3)
    kp = (k @ params["wk"]).reshape(B, Lk, n_head, d_k).transpose(0, 2, 1, 3)
    vp = (v @ params["wv"]).reshape(B, Lk, n_head, d_v).transpose(0, 2, 1, 3)
    scores = jnp.einsum('bhqd,bhkd->bhqk', qp / (d_k ** 0.5), kp)
    attn = jax.nn.softmax(scores, axis=-1)
    ctx = jnp.einsum('bhqk,bhkd->bhqd', attn, vp)
    ctx = ctx.transpose(0, 2, 1, 3).reshape(B, Lq, n_head * d_v)
    out = ctx @ params["wo"] + residual
    mean = out.mean(-1, keepdims=True)
    var = ((out - mean) ** 2).mean(-1, keepdims=True)
    out = (out - mean) / jnp.sqrt(var + 1e-6)
    out = out * params["ln_g"][0] + params["ln_b"][0]
    return out, attn


if __name__ == "__main__":
    # Small but lane-dense shapes: L = d_model = d_k = d_v = 128.
    B, L = 2, 128
    d_model = 128
    n_head, d_k, d_v = 2, 128, 128

    key = jax.random.PRNGKey(0)
    kq, kk, kv, kp = jax.random.split(key, 4)
    q = jax.random.normal(kq, (B, L, d_model), jnp.float32)
    k = jax.random.normal(kk, (B, L, d_model), jnp.float32)
    v = jax.random.normal(kv, (B, L, d_model), jnp.float32)

    params = make_params(kp, d_model, n_head, d_k, d_v)
    prepared = prepare_params(params, d_k=d_k)   # bf16 weights, Wq pre-scaled (hoisted)

    out, attn = multi_head_attention(q, k, v, prepared,
                                     n_head=n_head, d_k=d_k, d_v=d_v)
    jax.block_until_ready((out, attn))

    assert out.shape == (B, L, d_model)
    assert attn.shape == (B, n_head, L, L)

    # Loose tolerance: kernel runs bf16 MXU operands / bf16 attn writeback vs
    # an f32 reference.
    ref_out, ref_attn = mha_reference(q, k, v, params,
                                      n_head=n_head, d_k=d_k, d_v=d_v)
    attn_f32 = attn.astype(jnp.float32)
    assert bool(jnp.all(jnp.isfinite(out))) and bool(jnp.all(jnp.isfinite(attn_f32)))
    assert float(jnp.max(jnp.abs(out - ref_out))) < 1e-1
    assert float(jnp.max(jnp.abs(attn_f32 - ref_attn))) < 3e-2

    print("KERNEL_OK")
</pallas_src>

<mosaic_0001>
module attributes {stable_mosaic.version = 11 : i64} {
  func.func @mha_kernel(%arg0: i32, %arg1: i32, %arg2: memref<1x128x128xf32, #tpu.memory_space<vmem>>, %arg3: memref<1x128x128xbf16, #tpu.memory_space<vmem>>, %arg4: memref<1x128x128xbf16, #tpu.memory_space<vmem>>, %arg5: memref<128x256xbf16, #tpu.memory_space<vmem>>, %arg6: memref<128x256xbf16, #tpu.memory_space<vmem>>, %arg7: memref<128x256xbf16, #tpu.memory_space<vmem>>, %arg8: memref<256x128xbf16, #tpu.memory_space<vmem>>, %arg9: memref<1x128xf32, #tpu.memory_space<vmem>>, %arg10: memref<1x128xf32, #tpu.memory_space<vmem>>, %arg11: memref<1x128x128xf32, #tpu.memory_space<vmem>>, %arg12: memref<1x2x128x128xbf16, #tpu.memory_space<vmem>>, %arg13: memref<128x256xbf16, #tpu.memory_space<vmem>>, %arg14: memref<128x256xbf16, #tpu.memory_space<vmem>>) attributes {dimension_semantics = [#tpu.dimension_semantics<parallel>, #tpu.dimension_semantics<arbitrary>], iteration_bounds = array<i64: 2, 1>, scalar_prefetch = 0 : i64, scratch_operands = 2 : i64, tpu.core_type = #tpu.core_type<tc>, window_params = [{transform_indices = @transform_0, window_bounds = array<i64: 1, 128, 128>}, {transform_indices = @transform_1, window_bounds = array<i64: 1, 128, 128>}, {transform_indices = @transform_2, window_bounds = array<i64: 1, 128, 128>}, {pipeline_mode = #tpu.pipeline_mode<synchronous>, transform_indices = @transform_3, window_bounds = array<i64: 128, 256>}, {pipeline_mode = #tpu.pipeline_mode<synchronous>, transform_indices = @transform_4, window_bounds = array<i64: 128, 256>}, {pipeline_mode = #tpu.pipeline_mode<synchronous>, transform_indices = @transform_5, window_bounds = array<i64: 128, 256>}, {pipeline_mode = #tpu.pipeline_mode<synchronous>, transform_indices = @transform_6, window_bounds = array<i64: 256, 128>}, {pipeline_mode = #tpu.pipeline_mode<synchronous>, transform_indices = @transform_7, window_bounds = array<i64: 1, 128>}, {pipeline_mode = #tpu.pipeline_mode<synchronous>, transform_indices = @transform_8, window_bounds = array<i64: 1, 128>}, {transform_indices = @transform_9, window_bounds = array<i64: 1, 128, 128>}, {transform_indices = @transform_10, window_bounds = array<i64: 1, 2, 128, 128>}]} {
    %c0_i32 = arith.constant 0 : i32
    %0 = arith.cmpi eq, %arg1, %c0_i32 : i32
    %1 = arith.extui %0 : i1 to i32
    %c0_i32_0 = arith.constant 0 : i32
    %2 = arith.cmpi ne, %1, %c0_i32_0 : i32
    scf.if %2 {
      %c0_45 = arith.constant 0 : index
      %c0_46 = arith.constant 0 : index
      %c0_47 = arith.constant 0 : index
      %89 = vector.load %arg3[%c0_45, %c0_46, %c0_47] : memref<1x128x128xbf16, #tpu.memory_space<vmem>>, vector<1x128x128xbf16>
      %90 = vector.shape_cast %89 : vector<1x128x128xbf16> to vector<128x128xbf16>
      %c0_48 = arith.constant 0 : index
      %c0_49 = arith.constant 0 : index
      %91 = vector.load %arg6[%c0_48, %c0_49] : memref<128x256xbf16, #tpu.memory_space<vmem>>, vector<128x256xbf16>
      %cst_50 = arith.constant dense<0.000000e+00> : vector<128x256xf32>
      %92 = tpu.matmul %90, %91, %cst_50 {dimension_numbers = #tpu.dot_dimension_numbers<[1], [0], [0], [1], [0, 0, 1, 1], [], []>} : vector<128x128xbf16>, vector<128x256xbf16>, vector<128x256xf32> -> vector<128x256xf32>
      %93 = arith.truncf %92 : vector<128x256xf32> to vector<128x256xbf16>
      %c0_51 = arith.constant 0 : index
      %c0_52 = arith.constant 0 : index
      %94 = vector.load %arg13[%c0_51, %c0_52] : memref<128x256xbf16, #tpu.memory_space<vmem>>, vector<128x256xbf16>
      tpu.vector_store %arg13[%c0_51, %c0_52], %93 {strides = array<i32>} : memref<128x256xbf16, #tpu.memory_space<vmem>>, vector<128x256xbf16>,
      %c0_53 = arith.constant 0 : index
      %c0_54 = arith.constant 0 : index
      %c0_55 = arith.constant 0 : index
      %95 = vector.load %arg4[%c0_53, %c0_54, %c0_55] : memref<1x128x128xbf16, #tpu.memory_space<vmem>>, vector<1x128x128xbf16>
      %96 = vector.shape_cast %95 : vector<1x128x128xbf16> to vector<128x128xbf16>
      %c0_56 = arith.constant 0 : index
      %c0_57 = arith.constant 0 : index
      %97 = vector.load %arg7[%c0_56, %c0_57] : memref<128x256xbf16, #tpu.memory_space<vmem>>, vector<128x256xbf16>
      %cst_58 = arith.constant dense<0.000000e+00> : vector<128x256xf32>
      %98 = tpu.matmul %96, %97, %cst_58 {dimension_numbers = #tpu.dot_dimension_numbers<[1], [0], [0], [1], [0, 0, 1, 1], [], []>} : vector<128x128xbf16>, vector<128x256xbf16>, vector<128x256xf32> -> vector<128x256xf32>
      %99 = arith.truncf %98 : vector<128x256xf32> to vector<128x256xbf16>
      %c0_59 = arith.constant 0 : index
      %c0_60 = arith.constant 0 : index
      %100 = vector.load %arg14[%c0_59, %c0_60] : memref<128x256xbf16, #tpu.memory_space<vmem>>, vector<128x256xbf16>
      tpu.vector_store %arg14[%c0_59, %c0_60], %99 {strides = array<i32>} : memref<128x256xbf16, #tpu.memory_space<vmem>>, vector<128x256xbf16>,
    } else {
    }
    %c0 = arith.constant 0 : index
    %c0_1 = arith.constant 0 : index
    %c0_2 = arith.constant 0 : index
    %3 = vector.load %arg2[%c0, %c0_1, %c0_2] : memref<1x128x128xf32, #tpu.memory_space<vmem>>, vector<1x128x128xf32>
    %4 = vector.shape_cast %3 : vector<1x128x128xf32> to vector<128x128xf32>
    %c0_3 = arith.constant 0 : index
    %c0_4 = arith.constant 0 : index
    %c0_5 = arith.constant 0 : index
    %5 = vector.load %arg2[%c0_3, %c0_4, %c0_5] : memref<1x128x128xf32, #tpu.memory_space<vmem>>, vector<1x128x128xf32>
    %6 = vector.shape_cast %5 : vector<1x128x128xf32> to vector<128x128xf32>
    %7 = arith.truncf %6 : vector<128x128xf32> to vector<128x128xbf16>
    %c0_6 = arith.constant 0 : index
    %c0_7 = arith.constant 0 : index
    %8 = vector.load %arg5[%c0_6, %c0_7] : memref<128x256xbf16, #tpu.memory_space<vmem>>, vector<128x256xbf16>
    %cst = arith.constant dense<0.000000e+00> : vector<128x256xf32>
    %9 = tpu.matmul %7, %8, %cst {dimension_numbers = #tpu.dot_dimension_numbers<[1], [0], [0], [1], [0, 0, 1, 1], [], []>} : vector<128x128xbf16>, vector<128x256xbf16>, vector<128x256xf32> -> vector<128x256xf32>
    %10 = vector.extract_strided_slice %9 {offsets = [0, 0], sizes = [128, 128], strides = [1, 1]} : vector<128x256xf32> to vector<128x128xf32>
    %11 = arith.truncf %10 : vector<128x128xf32> to vector<128x128xbf16>
    %c0_8 = arith.constant 0 : index
    %c0_9 = arith.constant 0 : index
    %12 = vector.load %arg13[%c0_8, %c0_9] : memref<128x256xbf16, #tpu.memory_space<vmem>>, vector<128x128xbf16>
    %c0_10 = arith.constant 0 : index
    %c0_11 = arith.constant 0 : index
    %13 = vector.load %arg14[%c0_10, %c0_11] : memref<128x256xbf16, #tpu.memory_space<vmem>>, vector<128x128xbf16>
    %cst_12 = arith.constant dense<0.000000e+00> : vector<128x128xf32>
    %14 = tpu.matmul %11, %12, %cst_12 {dimension_numbers = #tpu.dot_dimension_numbers<[1], [1], [0], [0], [0, 0, 1, 0], [], []>} : vector<128x128xbf16>, vector<128x128xbf16>, vector<128x128xf32> -> vector<128x128xf32>
    %cst_13 = arith.constant dense<0xFF800000> : vector<128xf32>
    %15 = vector.multi_reduction <maximumf>, %14, %cst_13 [1] : vector<128x128xf32> to vector<128xf32>
    %16 = vector.shape_cast %15 : vector<128xf32> to vector<128x1xf32>
    %17 = vector.broadcast %16 : vector<128x1xf32> to vector<128x128xf32>
    %18 = arith.subf %14, %17 : vector<128x128xf32>
    %19 = math.exp %18 : vector<128x128xf32>
    %cst_14 = arith.constant dense<0.000000e+00> : vector<128xf32>
    %20 = vector.multi_reduction <add>, %19, %cst_14 [1] : vector<128x128xf32> to vector<128xf32>
    %21 = vector.shape_cast %20 : vector<128xf32> to vector<128x1xf32>
    %22 = tpu.reciprocal %21 {approx = true} : vector<128x1xf32> -> vector<128x1xf32>
    %23 = vector.broadcast %22 : vector<128x1xf32> to vector<128x128xf32>
    %24 = arith.mulf %19, %23 : vector<128x128xf32>
    %25 = arith.truncf %24 : vector<128x128xf32> to vector<128x128xbf16>
    %c0_15 = arith.constant 0 : index
    %c0_16 = arith.constant 0 : index
    %c0_17 = arith.constant 0 : index
    %c0_18 = arith.constant 0 : index
    %26 = vector.load %arg12[%c0_15, %c0_16, %c0_17, %c0_18] : memref<1x2x128x128xbf16, #tpu.memory_space<vmem>>, vector<1x1x128x128xbf16>
    %27 = vector.shape_cast %26 : vector<1x1x128x128xbf16> to vector<128x128xbf16>
    %28 = vector.shape_cast %25 : vector<128x128xbf16> to vector<1x1x128x128xbf16>
    tpu.vector_store %arg12[%c0_15, %c0_16, %c0_17, %c0_18], %28 {strides = array<i32>} : memref<1x2x128x128xbf16, #tpu.memory_space<vmem>>, vector<1x1x128x128xbf16>,
    %29 = arith.truncf %24 : vector<128x128xf32> to vector<128x128xbf16>
    %cst_19 = arith.constant dense<0.000000e+00> : vector<128x128xf32>
    %30 = tpu.matmul %29, %13, %cst_19 {dimension_numbers = #tpu.dot_dimension_numbers<[1], [0], [0], [1], [0, 0, 1, 1], [], []>} : vector<128x128xbf16>, vector<128x128xbf16>, vector<128x128xf32> -> vector<128x128xf32>
    %31 = vector.extract_strided_slice %9 {offsets = [0, 128], sizes = [128, 128], strides = [1, 1]} : vector<128x256xf32> to vector<128x128xf32>
    %32 = arith.truncf %31 : vector<128x128xf32> to vector<128x128xbf16>
    %c0_20 = arith.constant 0 : index
    %c128 = arith.constant 128 : index
    %33 = vector.load %arg13[%c0_20, %c128] : memref<128x256xbf16, #tpu.memory_space<vmem>>, vector<128x128xbf16>
    %c0_21 = arith.constant 0 : index
    %c128_22 = arith.constant 128 : index
    %34 = vector.load %arg14[%c0_21, %c128_22] : memref<128x256xbf16, #tpu.memory_space<vmem>>, vector<128x128xbf16>
    %cst_23 = arith.constant dense<0.000000e+00> : vector<128x128xf32>
    %35 = tpu.matmul %32, %33, %cst_23 {dimension_numbers = #tpu.dot_dimension_numbers<[1], [1], [0], [0], [0, 0, 1, 0], [], []>} : vector<128x128xbf16>, vector<128x128xbf16>, vector<128x128xf32> -> vector<128x128xf32>
    %cst_24 = arith.constant dense<0xFF800000> : vector<128xf32>
    %36 = vector.multi_reduction <maximumf>, %35, %cst_24 [1] : vector<128x128xf32> to vector<128xf32>
    %37 = vector.shape_cast %36 : vector<128xf32> to vector<128x1xf32>
    %38 = vector.broadcast %37 : vector<128x1xf32> to vector<128x128xf32>
    %39 = arith.subf %35, %38 : vector<128x128xf32>
    %40 = math.exp %39 : vector<128x128xf32>
    %cst_25 = arith.constant dense<0.000000e+00> : vector<128xf32>
    %41 = vector.multi_reduction <add>, %40, %cst_25 [1] : vector<128x128xf32> to vector<128xf32>
    %42 = vector.shape_cast %41 : vector<128xf32> to vector<128x1xf32>
    %43 = tpu.reciprocal %42 {approx = true} : vector<128x1xf32> -> vector<128x1xf32>
    %44 = vector.broadcast %43 : vector<128x1xf32> to vector<128x128xf32>
    %45 = arith.mulf %40, %44 : vector<128x128xf32>
    %46 = arith.truncf %45 : vector<128x128xf32> to vector<128x128xbf16>
    %c0_26 = arith.constant 0 : index
    %c1 = arith.constant 1 : index
    %c0_27 = arith.constant 0 : index
    %c0_28 = arith.constant 0 : index
    %47 = vector.load %arg12[%c0_26, %c1, %c0_27, %c0_28] : memref<1x2x128x128xbf16, #tpu.memory_space<vmem>>, vector<1x1x128x128xbf16>
    %48 = vector.shape_cast %47 : vector<1x1x128x128xbf16> to vector<128x128xbf16>
    %49 = vector.shape_cast %46 : vector<128x128xbf16> to vector<1x1x128x128xbf16>
    tpu.vector_store %arg12[%c0_26, %c1, %c0_27, %c0_28], %49 {strides = array<i32>} : memref<1x2x128x128xbf16, #tpu.memory_space<vmem>>, vector<1x1x128x128xbf16>,
    %50 = arith.truncf %45 : vector<128x128xf32> to vector<128x128xbf16>
    %cst_29 = arith.constant dense<0.000000e+00> : vector<128x128xf32>
    %51 = tpu.matmul %50, %34, %cst_29 {dimension_numbers = #tpu.dot_dimension_numbers<[1], [0], [0], [1], [0, 0, 1, 1], [], []>} : vector<128x128xbf16>, vector<128x128xbf16>, vector<128x128xf32> -> vector<128x128xf32>
    %52 = arith.truncf %30 : vector<128x128xf32> to vector<128x128xbf16>
    %53 = arith.truncf %51 : vector<128x128xf32> to vector<128x128xbf16>
    %54 = tpu.concatenate %52, %53 in 1 : vector<128x128xbf16>, vector<128x128xbf16> -> vector<128x256xbf16>
    %c0_30 = arith.constant 0 : index
    %c0_31 = arith.constant 0 : index
    %55 = vector.load %arg8[%c0_30, %c0_31] : memref<256x128xbf16, #tpu.memory_space<vmem>>, vector<256x128xbf16>
    %cst_32 = arith.constant dense<0.000000e+00> : vector<128x128xf32>
    %56 = tpu.matmul %54, %55, %cst_32 {dimension_numbers = #tpu.dot_dimension_numbers<[1], [0], [0], [1], [0, 0, 1, 1], [], []>} : vector<128x256xbf16>, vector<256x128xbf16>, vector<128x128xf32> -> vector<128x128xf32>
    %57 = arith.addf %56, %4 : vector<128x128xf32>
    %cst_33 = arith.constant dense<0.000000e+00> : vector<128xf32>
    %58 = vector.multi_reduction <add>, %57, %cst_33 [1] : vector<128x128xf32> to vector<128xf32>
    %59 = vector.shape_cast %58 : vector<128xf32> to vector<128x1xf32>
    %cst_34 = arith.constant 1.280000e+02 : f32
    %60 = vector.broadcast %cst_34 : f32 to vector<128x1xf32>
    %61 = arith.divf %59, %60 : vector<128x1xf32>
    %62 = vector.broadcast %61 : vector<128x1xf32> to vector<128x128xf32>
    %63 = arith.subf %57, %62 : vector<128x128xf32>
    %64 = arith.mulf %63, %63 : vector<128x128xf32>
    %cst_35 = arith.constant dense<0.000000e+00> : vector<128xf32>
    %65 = vector.multi_reduction <add>, %64, %cst_35 [1] : vector<128x128xf32> to vector<128xf32>
    %66 = vector.shape_cast %65 : vector<128xf32> to vector<128x1xf32>
    %cst_36 = arith.constant 1.280000e+02 : f32
    %67 = vector.broadcast %cst_36 : f32 to vector<128x1xf32>
    %68 = arith.divf %66, %67 : vector<128x1xf32>
    %69 = vector.broadcast %61 : vector<128x1xf32> to vector<128x128xf32>
    %70 = arith.subf %57, %69 : vector<128x128xf32>
    %cst_37 = arith.constant 9.99999997E-7 : f32
    %71 = vector.broadcast %cst_37 : f32 to vector<128x1xf32>
    %72 = arith.addf %68, %71 : vector<128x1xf32>
    %73 = math.rsqrt %72 : vector<128x1xf32>
    %74 = vector.broadcast %73 : vector<128x1xf32> to vector<128x128xf32>
    %75 = arith.mulf %70, %74 : vector<128x128xf32>
    %c0_38 = arith.constant 0 : index
    %c0_39 = arith.constant 0 : index
    %76 = vector.load %arg9[%c0_38, %c0_39] : memref<1x128xf32, #tpu.memory_space<vmem>>, vector<1x128xf32>
    %77 = vector.shape_cast %76 : vector<1x128xf32> to vector<128xf32>
    %78 = vector.shape_cast %77 : vector<128xf32> to vector<1x128xf32>
    %79 = vector.broadcast %78 : vector<1x128xf32> to vector<128x128xf32>
    %80 = arith.mulf %75, %79 : vector<128x128xf32>
    %c0_40 = arith.constant 0 : index
    %c0_41 = arith.constant 0 : index
    %81 = vector.load %arg10[%c0_40, %c0_41] : memref<1x128xf32, #tpu.memory_space<vmem>>, vector<1x128xf32>
    %82 = vector.shape_cast %81 : vector<1x128xf32> to vector<128xf32>
    %83 = vector.shape_cast %82 : vector<128xf32> to vector<1x128xf32>
    %84 = vector.broadcast %83 : vector<1x128xf32> to vector<128x128xf32>
    %85 = arith.addf %80, %84 : vector<128x128xf32>
    %c0_42 = arith.constant 0 : index
    %c0_43 = arith.constant 0 : index
    %c0_44 = arith.constant 0 : index
    %86 = vector.load %arg11[%c0_42, %c0_43, %c0_44] : memref<1x128x128xf32, #tpu.memory_space<vmem>>, vector<1x128x128xf32>
    %87 = vector.shape_cast %86 : vector<1x128x128xf32> to vector<128x128xf32>
    %88 = vector.shape_cast %85 : vector<128x128xf32> to vector<1x128x128xf32>
    tpu.vector_store %arg11[%c0_42, %c0_43, %c0_44], %88 {strides = array<i32>} : memref<1x128x128xf32, #tpu.memory_space<vmem>>, vector<1x128x128xf32>,
    return
  }
  func.func @transform_0(%arg0: i32, %arg1: i32) -> (i32, i32, i32) {
    %c0_i32 = arith.constant 0 : i32
    %c0_i32_0 = arith.constant 0 : i32
    return %arg0, %arg1, %c0_i32 : i32, i32, i32
  }
  func.func @transform_1(%arg0: i32, %arg1: i32) -> (i32, i32, i32) {
    %c0_i32 = arith.constant 0 : i32
    %c0_i32_0 = arith.constant 0 : i32
    %c0_i32_1 = arith.constant 0 : i32
    return %arg0, %c0_i32, %c0_i32_0 : i32, i32, i32
  }
  func.func @transform_2(%arg0: i32, %arg1: i32) -> (i32, i32, i32) {
    %c0_i32 = arith.constant 0 : i32
    %c0_i32_0 = arith.constant 0 : i32
    %c0_i32_1 = arith.constant 0 : i32
    return %arg0, %c0_i32, %c0_i32_0 : i32, i32, i32
  }
  func.func @transform_3(%arg0: i32, %arg1: i32) -> (i32, i32) {
    %c0_i32 = arith.constant 0 : i32
    %c0_i32_0 = arith.constant 0 : i32
    %c0_i32_1 = arith.constant 0 : i32
    return %c0_i32, %c0_i32_0 : i32, i32
  }
  func.func @transform_4(%arg0: i32, %arg1: i32) -> (i32, i32) {
    %c0_i32 = arith.constant 0 : i32
    %c0_i32_0 = arith.constant 0 : i32
    %c0_i32_1 = arith.constant 0 : i32
    return %c0_i32, %c0_i32_0 : i32, i32
  }
  func.func @transform_5(%arg0: i32, %arg1: i32) -> (i32, i32) {
    %c0_i32 = arith.constant 0 : i32
    %c0_i32_0 = arith.constant 0 : i32
    %c0_i32_1 = arith.constant 0 : i32
    return %c0_i32, %c0_i32_0 : i32, i32
  }
  func.func @transform_6(%arg0: i32, %arg1: i32) -> (i32, i32) {
    %c0_i32 = arith.constant 0 : i32
    %c0_i32_0 = arith.constant 0 : i32
    %c0_i32_1 = arith.constant 0 : i32
    return %c0_i32, %c0_i32_0 : i32, i32
  }
  func.func @transform_7(%arg0: i32, %arg1: i32) -> (i32, i32) {
    %c0_i32 = arith.constant 0 : i32
    %c0_i32_0 = arith.constant 0 : i32
    %c0_i32_1 = arith.constant 0 : i32
    return %c0_i32, %c0_i32_0 : i32, i32
  }
  func.func @transform_8(%arg0: i32, %arg1: i32) -> (i32, i32) {
    %c0_i32 = arith.constant 0 : i32
    %c0_i32_0 = arith.constant 0 : i32
    %c0_i32_1 = arith.constant 0 : i32
    return %c0_i32, %c0_i32_0 : i32, i32
  }
  func.func @transform_9(%arg0: i32, %arg1: i32) -> (i32, i32, i32) {
    %c0_i32 = arith.constant 0 : i32
    %c0_i32_0 = arith.constant 0 : i32
    return %arg0, %arg1, %c0_i32 : i32, i32, i32
  }
  func.func @transform_10(%arg0: i32, %arg1: i32) -> (i32, i32, i32, i32) {
    %c0_i32 = arith.constant 0 : i32
    %c0_i32_0 = arith.constant 0 : i32
    %c0_i32_1 = arith.constant 0 : i32
    return %arg0, %c0_i32, %arg1, %c0_i32_0 : i32, i32, i32, i32
  }
}

</mosaic_0001>

<bundles_post_ra>
// kernel: tpu_custom_call.1
= control target key start
LH: loop header
LB: loop body
LE: loop exit
PB: predicated region body
PF: predicated region fallthrough
CT: control target
= control target key end

     0   :  { %s5803_s0 = inlined_call_operand.hbm [shape: f32[2,128,128], index: 0, kind: input, shape index: {}]   ;;  %s5804_s1 = inlined_call_operand.hbm [shape: bf16[2,128,128], index: 1, kind: input, shape index: {}]   ;;  %s5805_s2 = inlined_call_operand.hbm [shape: bf16[2,128,128], index: 2, kind: input, shape index: {}]   ;;  %s5806_s3 = inlined_call_operand.hbm [shape: bf16[128,256], index: 3, kind: input, shape index: {}]   ;;  %s5807_s4 = inlined_call_operand.hbm [shape: bf16[128,256], index: 4, kind: input, shape index: {}]   ;;  %s5808_s5 = inlined_call_operand.hbm [shape: bf16[128,256], index: 5, kind: input, shape index: {}]   ;;  %s5809_s6 = inlined_call_operand.hbm [shape: bf16[256,128], index: 6, kind: input, shape index: {}]   ;;  %s5810_s7 = inlined_call_operand.vmem [shape: f32[1,128], index: 7, kind: input, shape index: {}]   ;;  %s5811_s8 = inlined_call_operand.vmem [shape: f32[1,128], index: 8, kind: input, shape index: {}]   ;;  %s5812_s9 = inlined_call_operand.hbm [shape: f32[2,128,128], index: 9, kind: output, shape index: {0}]   ;;  %s5813_s10 = inlined_call_operand.hbm [shape: bf16[2,2,128,128], index: 10, kind: output, shape index: {1}]  }
   0x1   :  { %5830 = sst [smem:[#allocation31_spill]] %s5804_s1 }
   0x2   :  { %5831 = sst [smem:[#allocation32_spill]] %s5805_s2 }
   0x3   :  { %5832 = sst [smem:[#allocation33_spill]] %s5806_s3 }
   0x4   :  { %5833 = sst [smem:[#allocation34_spill]] %s5808_s5 }
   0x5   :  { %5834 = sst [smem:[#allocation35_spill]] %s5810_s7 }
   0x6   :  { %5835 = sst [smem:[#allocation36_spill]] %s5811_s8 }
   0x7   :  { %5836 = sst [smem:[#allocation37_spill]] %s5812_s9 }
   0x8   :  { %5837 = sst [smem:[#allocation38_spill]] %s5813_s10 }
   0x9   :  { %16 = vsyncpa [#allocation5], 0 }
   0xa   :  { %18 = vsyncpa [#allocation5 + $0x1], 0 }
   0xb   :  { %19 = vsyncpa [#allocation8], 0 }
   0xc   :  { %21 = vsyncpa [#allocation8 + $0x1], 0 }
   0xd   :  { %22 = vsyncpa [#allocation11], 0 }
   0xe   :  { %23 = vsyncpa [#allocation14], 0 }
   0xf   :  { %24 = vsyncpa [#allocation6], 0 }
  0x10   :  { %26 = vsyncpa [#allocation6 + $0x1], 0 }
  0x11   :  { %27 = vsyncpa [#allocation18], 0 }
  0x12   :  { %29 = vsyncpa [#allocation18 + $0x1], 0  ;;  %s4875_s13 = smov 0   ;;  %s4877_s14 = smov 0  }
  0x13   :  { %s4879_s15 = smov 0   ;;  %s4881_s16 = smov 0  }
  0x14   :  { %s4883_s17 = smov 0   ;;  %s4885_s18 = smov 0  }
  0x15 LB: > { %5838 = sst [smem:[#allocation25_spill]] %s4780_s13  ;;  %s4906_s19 = sadd.s32 4294967295, %s4800_s18   ;;  %s4800_s18 = sphi %s4885_s18, %s35_s18   ;;  %s4796_s17 = sphi %s4883_s17, %s5880_s17   ;;  %s4792_s16 = sphi %s4881_s16, %s5879_s16   ;;  %s4788_s15 = sphi %s4879_s15, %s5875_s15   ;;  %s4784_s14 = sphi %s4877_s14, %s5878_s14   ;;  %s4780_s13 = sphi %s4875_s13, %s5877_s13  }
  0x16   : > { %5839 = sst [smem:[#allocation26_spill]] %s4788_s15  ;;  %s3387_s20 = sadd.s32 4294967294, %s4800_s18  }
  0x17   : > { %5840 = sst [smem:[#allocation27_spill]] %s4800_s18  ;;  %p69_p0 = scmp.ne.s32.totalorder %s4784_s14, %s4780_s13 }
  0x18   : > { %p5814_p1 = scmp.eq.s32.totalorder %s4906_s19, 0  ;;  %p273_p2 = scmp.eq.s32.totalorder %s4906_s19, 1 }
  0x19   : > { %p279_p3 = scmp.eq.s32.totalorder %s3387_s20, 1  ;;  %p3388_p5 = scmp.ge.s32.totalorder %s4800_s18, 1 }
  0x1a   : > { %p4915_p4 = por %p5814_p1, %p69_p0  ;;  %p314_p7 = scmp.lt.s32.totalorder %s4800_s18, 3 }
  0x1b   : > { %p4920_p6 = por %p279_p3, %p69_p0  ;;  %s4802_s24 = smov [#allocation10]  }
  0x1c   : > { %p4925_p8 = pnand %p3388_p5, %p314_p7  ;;  %s326_s25 = sshll.u32 %s4802_s24, 4  ;;  %s327_s25 = int_to_ptr.vmem [resolvable:$true] %s326_s25 }
  0x1d   : > { %s5842_s22 = scalar_select %p4920_p6, 1, 0 }
  0x1e   : > { %p4077_p9 = pneg %p4925_p8  ;;  %s4803_s27 = smov [#allocation13]  }
  0x1f   : > { %5843 = sst [smem:[#allocation28_spill]] %s5842_s22  ;;  %s352_s28 = sshll.u32 %s4803_s27, 4  ;;  %s353_s28 = int_to_ptr.vmem [resolvable:$true] %s352_s28 }
  0x20   : > { %p4934_p11 = pnand %p4077_p9, %p5814_p1  ;;  %s4501_s29 = scalar_lea.vmem %s327_s25, 2048 }
  0x21   : > { %p4502_p13 = scmp.ne.s32.totalorder %s327_s25, %s4501_s29  ;;  %p4509_p5 = scmp.lt.s32.totalorder %s327_s25, %s327_s25 }
  0x22   : > { %p5826_p12 = pneg %p4934_p11  ;;  %p4510_p7 = scmp.lt.s32.totalorder %s4501_s29, %s4501_s29 }
  0x24   : > { %p4504_p0 = pnand %p4502_p13, %p5826_p12  ;;  %p4511_p10 = por %p4510_p7, %p4509_p5 }
  0x26   : > { %p4505_p3 = pneg %p4504_p0 }
  0x28   : > { %p4512_p9 = pnand %p4511_p10, %p4505_p3 }
  0x2a   : > { %4515 = shalt.err (!%p4512_p9)
}
  0x2b   : > { %s5815_s30 = smov 128   ;;  %s5817_s11 = smov 8  }
  0x2c   : > { %s5846_s3 = sld [smem:[#allocation33_spill]]  ;;  %s4527_s24 = scalar_lea.vmem %s353_s28, 2048 }
  0x2d   : > { %p4528_p13 = scmp.ne.s32.totalorder %s353_s28, %s4527_s24  ;;  %p4535_p10 = scmp.lt.s32.totalorder %s353_s28, %s353_s28 }
  0x2e   : > { %p4536_p3 = scmp.lt.s32.totalorder %s4527_s24, %s4527_s24 }
  0x2f   : > { %p4530_p0 = pnand %p4528_p13, %p5826_p12 }
  0x30   : > { %p4537_p7 = por %p4536_p3, %p4535_p10 }
  0x31   : > { %p4531_p5 = pneg %p4530_p0 }
  0x32   : > { %4080 = dma.hbm_to_vmem [thread:$0]  (!%p4934_p11), %s5846_s3, 2048, %s327_s25, [#allocation11], %s5815_s30, %s5815_s30, %s5817_s11  }
  0x33   : > { %p4538_p9 = pnand %p4537_p7, %p4531_p5 }
  0x35   : > { %4541 = shalt.err (!%p4538_p9)
}
  0x36   : > { %s5847_s5 = sld [smem:[#allocation34_spill]]  ;;  %s47_s25 = sadd.s32 1, %s4796_s17 }
  0x37   : > { %s56_s12 = sadd.s32 1, %s4788_s15  ;;  %p49_p13 = scmp.ge.s32.totalorder %s47_s25, 2 }
  0x38   : > { %p63_p0 = scmp.ne.s32.totalorder %s4788_s15, %s4784_s14  ;;  %p64_p5 = scmp.eq.s32.totalorder %s4800_s18, 0 }
  0x39   : > { %s5882_s25 = smov (%p49_p13, %s47_s25), 0  ;;  %p4111_p9 = scmp.lt.s32.totalorder %s4800_s18, 2 }
  0x3a   : > { %5848 = sst [smem:[#allocation29_spill]] %s5882_s25  ;;  %p65_p10 = por %p64_p5, %p63_p0 }
  0x3b   : > { %p4971_p3 = por %p273_p2, %p63_p0  ;;  %s51_s24 = ssub.s32 %s4796_s17, %s5882_s25 }
  0x3c   : > { %4086 = dma.hbm_to_vmem [thread:$0]  (!%p4934_p11), %s5847_s5, 2048, %s353_s28, [#allocation14], %s5815_s30, %s5815_s30, %s5817_s11  }
  0x3d   : > { %p54_p7 = scmp.eq.s32.totalorder %s51_s24, 0  ;;  %s4979_s27 = sand.u32 1, %s4788_s15  }
  0x3e   : > { %s408_s28 = sand.u32 1, %s4800_s18   ;;  %p4985_p1 = pnand %p4111_p9, %p65_p10 }
  0x3f   : > { %s4983_s29 = scalar_select %p54_p7, %s4788_s15, %s56_s12  }
  0x40   : > { %s3397_s11 = sshll.u32 %s4979_s27, 6  ;;  %s3616_s3 = sshll.u32 %s4796_s17, 10 }
  0x41   : > { %5850 = sst [smem:[#allocation30_spill]] %s4983_s29  ;;  %s412_s24 = scalar_lea.vmem [#allocation7], %s3397_s11 }
  0x42   : > { %s5852_s1 = sld [smem:[#allocation31_spill]]  ;;  %s419_s13 = sshll.u32 %s412_s24, 4  ;;  %s420_s13 = int_to_ptr.vmem [resolvable:$true] %s419_s13 }
  0x43   : > { %s4994_s9 = scalar_lea.sflag [#allocation8], %s408_s28  ;;  %p5828_p2 = pneg %p4985_p1 }
  0x44   : > { %s4555_s12 = scalar_lea.vmem %s420_s13, 1024  ;;  %s4806_s29 = smov [#allocation7]  }
  0x45   : > { %p4556_p13 = scmp.ne.s32.totalorder %s420_s13, %s4555_s12  ;;  %s4560_s15 = sshll.u32 %s4806_s29, 4  ;;  %s4561_s15 = int_to_ptr.vmem [resolvable:$false] %s4560_s15 }
  0x46   : > { %s4562_s18 = scalar_lea.vmem %s4561_s15, 2048  ;;  %p4563_p10 = scmp.lt.s32.totalorder %s420_s13, %s4561_s15 }
  0x47   : > { %p4558_p0 = pnand %p4556_p13, %p5828_p2  ;;  %p4564_p7 = scmp.lt.s32.totalorder %s4562_s18, %s4555_s12 }
  0x48   : > { %s418_s25 = scalar_lea.hbm %s5852_s1, %s3616_s3 }
  0x49   : > { %p4559_p5 = pneg %p4558_p0  ;;  %p4565_p9 = por %p4564_p7, %p4563_p10 }
  0x4b   : > { %p4566_p12 = pnand %p4565_p9, %p4559_p5 }
  0x4d   : > { %4569 = shalt.err (!%p4566_p12)
}
  0x4e   : > { %s5829_s5 = smov 64   ;;  %s4808_s22 = smov 4  }
  0x4f   : > { %4096 = dma.hbm_to_vmem [thread:$0]  (!%p4985_p1), %s418_s25, 1024, %s420_s13, %s4994_s9, %s5829_s5, %s5829_s5, %s4808_s22  }
  0x50   : > { %s5853_s2 = sld [smem:[#allocation32_spill]]  ;;  %s5012_s15 = scalar_lea.vmem [#allocation9], %s3397_s11 }
  0x51   : > { %s440_s18 = sshll.u32 %s5012_s15, 4  ;;  %s4809_s12 = smov [#allocation12]   ;;  %s5044_s18 = int_to_ptr.vmem [resolvable:$true] %s440_s18 }
  0x52   : > { %s339_s1 = sshll.u32 %s4809_s12, 4  ;;  %s4810_s8 = smov [#allocation15]   ;;  %s340_s1 = int_to_ptr.vmem [resolvable:$true] %s339_s1 }
  0x53   : > { %s365_s7 = sshll.u32 %s4810_s8, 4  ;;  %s4581_s10 = scalar_lea.vmem %s340_s1, 2048  ;;  %s366_s7 = int_to_ptr.vmem [resolvable:$true] %s365_s7 }
  0x54   : > { %p4582_p12 = scmp.ne.s32.totalorder %s340_s1, %s4581_s10  ;;  %p5854_p13 = pneg %p4934_p11 }
  0x55   : > { %p4589_p10 = scmp.lt.s32.totalorder %s340_s1, %s340_s1  ;;  %p4590_p7 = scmp.lt.s32.totalorder %s4581_s10, %s4581_s10 }
  0x56   : > { %s5010_s29 = scalar_lea.hbm %s5853_s2, %s3616_s3  ;;  %p4584_p0 = pnand %p4582_p12, %p5854_p13 }
  0x57   : > { %p4591_p9 = por %p4590_p7, %p4589_p10 }
  0x58   : > { %p4585_p5 = pneg %p4584_p0 }
  0x5a   : > { %p4592_p2 = pnand %p4591_p9, %p4585_p5 }
  0x5c   : > { %4595 = shalt.err (!%p4592_p2)
}
  0x5d   : > { %s5855_s3 = smov 8   ;;  %s5856_s13 = smov 128  }
  0x5e   : > { %4083 = dma.hbm_to_vmem [thread:$0]  (!%p4934_p11), %s5807_s4, 2048, %s340_s1, [#allocation11], %s5856_s13, %s5856_s13, %s5855_s3  }
  0x5f   : > { %s4607_s8 = scalar_lea.vmem %s366_s7, 2048  ;;  %p5857_p12 = pmov %p5854_p13 }
  0x60   : > { %p4608_p6 = scmp.ne.s32.totalorder %s366_s7, %s4607_s8  ;;  %p4615_p10 = scmp.lt.s32.totalorder %s366_s7, %s366_s7 }
  0x61   : > { %p4616_p5 = scmp.lt.s32.totalorder %s4607_s8, %s4607_s8 }
  0x62   : > { %p4610_p13 = pnand %p4608_p6, %p5857_p12 }
  0x63   : > { %p4617_p2 = por %p4616_p5, %p4615_p10 }
  0x64   : > { %p4611_p0 = pneg %p4610_p13 }
  0x66   : > { %p4618_p7 = pnand %p4617_p2, %p4611_p0 }
  0x68   : > { %4621 = shalt.err (!%p4618_p7)
}
  0x69   : > { %4089 = dma.hbm_to_vmem [thread:$0]  (!%p4934_p11), %s5809_s6, 2048, %s366_s7, [#allocation14], %s5829_s5, %s5829_s5, %s4808_s22  }
  0x6a   : > { %s3394_s1 = sshll.u32 %s4979_s27, 7  ;;  %s3615_s24 = sshll.u32 %s4796_s17, 11 }
  0x6b   : > { %s397_s25 = scalar_lea.hbm %s5803_s0, %s3615_s24  ;;  %s389_s26 = scalar_lea.vmem [#allocation4], %s3394_s1 }
  0x6c   : > { %s398_s8 = sshll.u32 %s389_s26, 4  ;;  %s386_s2 = scalar_lea.sflag [#allocation5], %s4979_s27  ;;  %s399_s8 = int_to_ptr.vmem [resolvable:$true] %s398_s8 }
  0x6d   : > { %s4635_s10 = scalar_lea.vmem %s399_s8, 2048  ;;  %p5858_p9 = pneg %p4985_p1 }
  0x6e   : > { %p4636_p6 = scmp.ne.s32.totalorder %s399_s8, %s4635_s10  ;;  %s4811_s7 = smov [#allocation4]  }
  0x6f   : > { %s4640_s28 = sshll.u32 %s4811_s7, 4  ;;  %s4641_s28 = int_to_ptr.vmem [resolvable:$false] %s4640_s28 }
  0x70   : > { %p4638_p12 = pnand %p4636_p6, %p5858_p9  ;;  %s4642_s5 = scalar_lea.vmem %s4641_s28, 4096 }
  0x71   : > { %p4643_p11 = scmp.lt.s32.totalorder %s399_s8, %s4641_s28  ;;  %p4644_p0 = scmp.lt.s32.totalorder %s4642_s5, %s4635_s10 }
  0x72   : > { %p4639_p13 = pneg %p4638_p12 }
  0x73   : > { %p4645_p10 = por %p4644_p0, %p4643_p11 }
  0x75   : > { %p4646_p5 = pnand %p4645_p10, %p4639_p13 }
  0x77   : > { %4649 = shalt.err (!%p4646_p5)
}
  0x78   : > { %4093 = dma.hbm_to_vmem [thread:$0]  (!%p4985_p1), %s397_s25, 2048, %s399_s8, %s386_s2, %s5856_s13, %s5856_s13, %s5855_s3  }
  0x79   : > { %s4663_s27 = scalar_lea.vmem %s5044_s18, 1024  ;;  %p5859_p7 = pmov %p5858_p9 }
  0x7a   : > { %p4664_p2 = scmp.ne.s32.totalorder %s5044_s18, %s4663_s27  ;;  %s4812_s5 = smov [#allocation9]  }
  0x7b   : > { %s4668_s15 = sshll.u32 %s4812_s5, 4  ;;  %s4669_s15 = int_to_ptr.vmem [resolvable:$false] %s4668_s15 }
  0x7c   : > { %p4666_p6 = pnand %p4664_p2, %p5859_p7  ;;  %s4670_s1 = scalar_lea.vmem %s4669_s15, 2048 }
  0x7d   : > { %p4671_p12 = scmp.lt.s32.totalorder %s5044_s18, %s4669_s15  ;;  %p4672_p13 = scmp.lt.s32.totalorder %s4670_s1, %s4663_s27 }
  0x7e   : > { %p4667_p9 = pneg %p4666_p6 }
  0x7f   : > { %p4673_p11 = por %p4672_p13, %p4671_p12 }
  0x81   : > { %p4674_p0 = pnand %p4673_p11, %p4667_p9 }
  0x83   : > { %4677 = shalt.err (!%p4674_p0)
}
  0x84   : > { %s5860_s24 = smov 64   ;;  %452 = sbr.rel (%p4925_p8) target bundleno = 1807 (0x70f), region = 56 }
  0x85   : > { %4099 = dma.hbm_to_vmem [thread:$0]  (!%p4985_p1), %s5010_s29, 1024, %s5044_s18, %s4994_s9, %s5860_s24, %s5860_s24, %s4808_s22  }
  0x86   : > { %s5072_s2 = sand.u32 (!%p4925_p8), 1, %s4784_s14  }
  0x87   : > { %s5075_s3 = sshll.u32 (!%p4925_p8), %s5072_s2, 7  ;;  %s455_s30 = scalar_lea.sflag (!%p4925_p8), [#allocation5], %s5072_s2 }
  0x88   : > { %s5079_s13 = scalar_lea.vmem (!%p4925_p8), [#allocation4], %s5075_s3 }
  0x89   : > { %4755 = dma.done.wait (%p4915_p4), %s455_s30, 2048  }
  0x8a   : > { %4757 = vsyncadd (%p4915_p4), %s455_s30, 4294965248  ;;  %s463_s9 = sand.u32 1, %s4906_s19   ;;  %s3405_s23 = sshll.u32 %s5072_s2, 6 }
  0x8b   : > { %s464_s22 = scalar_lea.sflag [#allocation8], %s463_s9  ;;  %s5087_s29 = scalar_lea.vmem [#allocation7], %s3405_s23 }
  0x8c   : > { %4759 = dma.done.wait (%p4915_p4), %s464_s22, 2048  }
  0x8d   : > { %4761 = vsyncadd (%p4915_p4), %s464_s22, 4294965248  ;;  %s5093_s18 = scalar_lea.vmem [#allocation9], %s3405_s23  ;;  %p5861_p1 = scmp.eq.s32.totalorder %s4906_s19, 0 }
  0x8f   : > { %4763 = dma.done.wait (%p5861_p1), [#allocation11], 4096   ;;  %p5862_p8 = pmov %p5861_p1 }
  0x90   : > { %p5863_p10 = pmov %p5861_p1 }
  0x91   : > { %4765 = vsyncadd (%p5862_p8), [#allocation11], 4294963200 }
  0x92   : > { %4767 = dma.done.wait (%p5863_p10), [#allocation14], 4096   ;;  %p5864_p5 = pmov %p5861_p1 }
  0x93   : > { %v4813_v0 = vmov 0   ;;  %v4178_v1 = vld [vmem:[#allocation12 + $0x74] ss:$8 sps:$4 sm:$0xff]   ;;  %v4180_v2 = vld [vmem:[#allocation12 + $0x70] ss:$8 sps:$4 sm:$0xff]   ;;  %v4202_v18 = vld [vmem:[%s5087_s29 + $0x20] sm:$0xff]  }
  0x94   : > { %4769 = vsyncadd (%p5864_p5), [#allocation14], 4294963200  ;;  %784 = vmatprep.mubr.bf16.mxu1 %v4813_v0  ;;  %744 = vmatprep.mubr.bf16.mxu0 %v4813_v0  ;;  %v4181_v3 = vld [vmem:[#allocation12 + $0x64] ss:$8 sps:$4 sm:$0xff]   ;;  %v4183_v4 = vld [vmem:[#allocation12 + $0x60] ss:$8 sps:$4 sm:$0xff]  }
  0x95   : > { %4035 = vmatprep.subr.bf16.mxu1 %v4178_v1  ;;  %712 = vmatprep.subr.bf16.mxu0 %v4178_v1  ;;  %v4184_v5 = vld [vmem:[#allocation12 + $0x54] ss:$8 sps:$4 sm:$0xff]   ;;  %v4186_v6 = vld [vmem:[#allocation12 + $0x50] ss:$8 sps:$4 sm:$0xff]   ;;  %v4187_v7 = vld [vmem:[#allocation12 + $0x44] ss:$8 sps:$4 sm:$0xff]  }
  0x96   : > { %4043 = vmatpush1.bf16.msra.mxu1 %v4180_v2  ;;  %713 = vmatpush1.bf16.msra.mxu0 %v4180_v2  ;;  %v4189_v8 = vld [vmem:[#allocation12 + $0x40] ss:$8 sps:$4 sm:$0xff]   ;;  %v4190_v9 = vld [vmem:[#allocation12 + $0x34] ss:$8 sps:$4 sm:$0xff]   ;;  %v4192_v10 = vld [vmem:[#allocation12 + $0x30] ss:$8 sps:$4 sm:$0xff]  }
  0x97   : > { %4036 = vmatprep.subr.bf16.mxu1 %v4181_v3  ;;  %714 = vmatprep.subr.bf16.mxu0 %v4181_v3  ;;  %v4193_v11 = vld [vmem:[#allocation12 + $0x24] ss:$8 sps:$4 sm:$0xff]   ;;  %v4195_v12 = vld [vmem:[#allocation12 + $0x20] ss:$8 sps:$4 sm:$0xff]   ;;  %v4196_v13 = vld [vmem:[#allocation12 + $0x14] ss:$8 sps:$4 sm:$0xff]  }
  0x98   : > { %v4198_v14 = vld [vmem:[#allocation12 + $0x10] ss:$8 sps:$4 sm:$0xff]   ;;  %v4199_v15 = vld [vmem:[#allocation12 + $0x4] ss:$8 sps:$4 sm:$0xff]   ;;  %v4201_v16 = vld [vmem:[#allocation12] ss:$8 sps:$4 sm:$0xff]  }
  0x99   : > { %v4209_v17 = vld [vmem:[#allocation10 + $0x74] ss:$8 sps:$4 sm:$0xff]   ;;  %v4206_v19 = vld [vmem:[%s5087_s29] sm:$0xff]   ;;  %v4207_v20 = vld [vmem:[#allocation10 + $0x70] ss:$8 sps:$4 sm:$0xff]   ;;  %s5443_s19 = scalar_lea.vmem [#allocation17], %s5075_s3 }
  0x9a   : > { %4044 = vmatpush1.bf16.msra.mxu1 %v4183_v4  ;;  %715 = vmatpush1.bf16.msra.mxu0 %v4183_v4  ;;  %v4213_v21 = vld [vmem:[#allocation10 + $0x64] ss:$8 sps:$4 sm:$0xff]   ;;  %v4211_v22 = vld [vmem:[#allocation10 + $0x60] ss:$8 sps:$4 sm:$0xff]   ;;  %v4234_v23 = vld [vmem:[#allocation13 + $0x70] ss:$8 sps:$4 sm:$0xff]  }
  0x9b   : > { %4037 = vmatprep.subr.bf16.mxu1 %v4184_v5  ;;  %716 = vmatprep.subr.bf16.mxu0 %v4184_v5  ;;  %v4236_v24 = vld [vmem:[#allocation13 + $0x74] ss:$8 sps:$4 sm:$0xff]   ;;  %v4239_v26 = vld [vmem:[#allocation13 + $0x64] ss:$8 sps:$4 sm:$0xff]   ;;  %v4214_v29 = vld [vmem:[#allocation10 + $0x50] ss:$8 sps:$4 sm:$0xff]  }
  0x9c   : > { %v4216_v25 = vld [vmem:[#allocation10 + $0x54] ss:$8 sps:$4 sm:$0xff]   ;;  %v4203_v27 = vld [vmem:[%s5087_s29 + $0x28] sm:$0xff]   ;;  %v4240_v36 = vld [vmem:[#allocation13 + $0x50] ss:$8 sps:$4 sm:$0xff]   ;;  %s3682_s21 = sshll.u32 %s4792_s16, 11 }
  0x9d   : > { %v4210_v28 = vld [vmem:[%s5087_s29 + $0x8] sm:$0xff]   ;;  %v4242_v32 = vld [vmem:[#allocation13 + $0x54] ss:$8 sps:$4 sm:$0xff]   ;;  %v4221_v38 = vld [vmem:[#allocation10 + $0x30] ss:$8 sps:$4 sm:$0xff]   ;;  %s5865_s25 = sld [smem:[#allocation38_spill]] }
  0x9e   : > { %4045 = vmatpush1.bf16.msra.mxu1 %v4186_v6  ;;  %717 = vmatpush1.bf16.msra.mxu0 %v4186_v6  ;;  %v4220_v30 = vld [vmem:[#allocation10 + $0x44] ss:$8 sps:$4 sm:$0xff]   ;;  %v4237_v31 = vld [vmem:[#allocation13 + $0x60] ss:$8 sps:$4 sm:$0xff]   ;;  %v4204_v34 = vld [vmem:[%s5087_s29 + $0x30] sm:$0xff]   ;;  %s3183_s8 = sshll.u32 %s5443_s19, 4  ;;  %s5645_s8 = int_to_ptr.vmem [resolvable:$true] %s3183_s8 }
  0x9f   : > { %4038 = vmatprep.subr.bf16.mxu1 %v4187_v7  ;;  %718 = vmatprep.subr.bf16.mxu0 %v4187_v7  ;;  %v4218_v33 = vld [vmem:[#allocation10 + $0x40] ss:$8 sps:$4 sm:$0xff]   ;;  %v4223_v35 = vld [vmem:[#allocation10 + $0x34] ss:$8 sps:$4 sm:$0xff]   ;;  %v4227_v39 = vld [vmem:[#allocation10 + $0x24] ss:$8 sps:$4 sm:$0xff]  }
  0xa0   : > { %v4217_v37 = vld [vmem:[%s5087_s29 + $0x10] sm:$0xff]   ;;  %v4225_v40 = vld [vmem:[#allocation10 + $0x20] ss:$8 sps:$4 sm:$0xff]   ;;  %v4245_v41 = vld [vmem:[#allocation13 + $0x44] ss:$8 sps:$4 sm:$0xff]   ;;  %s3150_s10 = scalar_lea.sflag [#allocation18], %s5072_s2 }
  0xa1   : > { %v4230_v42 = vld [vmem:[#allocation10 + $0x14] ss:$8 sps:$4 sm:$0xff]   ;;  %v4243_v43 = vld [vmem:[#allocation13 + $0x40] ss:$8 sps:$4 sm:$0xff]   ;;  %v4228_v47 = vld [vmem:[#allocation10 + $0x10] ss:$8 sps:$4 sm:$0xff]  }
  0xa2   : > { %4046 = vmatpush1.bf16.msra.mxu1 %v4189_v8  ;;  %719 = vmatpush1.bf16.msra.mxu0 %v4189_v8  ;;  %v4248_v44 = vld [vmem:[#allocation13 + $0x34] ss:$8 sps:$4 sm:$0xff]   ;;  %v4233_v48 = vld [vmem:[#allocation10 + $0x4] ss:$8 sps:$4 sm:$0xff]   ;;  %v4246_v49 = vld [vmem:[#allocation13 + $0x30] ss:$8 sps:$4 sm:$0xff]  }
  0xa3   : > { %4039 = vmatprep.subr.bf16.mxu1 %v4190_v9  ;;  %720 = vmatprep.subr.bf16.mxu0 %v4190_v9  ;;  %v4205_v45 = vld [vmem:[%s5087_s29 + $0x38] sm:$0xff]   ;;  %v4251_v50 = vld [vmem:[#allocation13 + $0x24] ss:$8 sps:$4 sm:$0xff]   ;;  %v4231_v51 = vld [vmem:[#allocation10] ss:$8 sps:$4 sm:$0xff]   ;;  %s5642_s26 = scalar_lea.hbm %s5865_s25, %s3682_s21  ;;  %s4678_s7 = scalar_lea.vmem %s5645_s8, 2048 }
  0xa4   : > { %v4224_v46 = vld [vmem:[%s5087_s29 + $0x18] sm:$0xff]   ;;  %v1322_v52 = vld [vmem:[%s5079_s13] sm:$0xff]  ;;  %v1323_v53 = vld [vmem:[%s5079_s13 + $0x8] sm:$0xff]  ;;  %p4679_p4 = scmp.ne.s32.totalorder %s5645_s8, %s4678_s7  ;;  %s4814_s28 = smov [#allocation17]  }
  0xa5   : > { %v4249_v54 = vld [vmem:[#allocation13 + $0x20] ss:$8 sps:$4 sm:$0xff]   ;;  %v4254_v55 = vld [vmem:[#allocation13 + $0x14] ss:$8 sps:$4 sm:$0xff]   ;;  %v1338_v56 = vpack.c.bf16 %v1323_v53, %v1322_v52  ;;  %v4252_v57 = vld [vmem:[#allocation13 + $0x10] ss:$8 sps:$4 sm:$0xff]  }
  0xa6   : > { %4047 = vmatpush1.bf16.msra.mxu1 %v4192_v10  ;;  %721 = vmatpush1.bf16.msra.mxu0 %v4192_v10  ;;  %v4257_v58 = vld [vmem:[#allocation13 + $0x4] ss:$8 sps:$4 sm:$0xff]   ;;  %v1324_v59 = vld [vmem:[%s5079_s13 + $0x10] sm:$0xff]  ;;  %v1325_v60 = vld [vmem:[%s5079_s13 + $0x18] sm:$0xff]  ;;  %p4680_p2 = pnand %p4679_p4, %p4971_p3  ;;  %s4682_s27 = sshll.u32 %s4814_s28, 4  ;;  %s4683_s27 = int_to_ptr.vmem [resolvable:$false] %s4682_s27 }
  0xa7   : > { %4040 = vmatprep.subr.bf16.mxu1 %v4193_v11  ;;  %722 = vmatprep.subr.bf16.mxu0 %v4193_v11  ;;  %v4255_v61 = vld [vmem:[#allocation13] ss:$8 sps:$4 sm:$0xff]   ;;  %v1339_v62 = vpack.c.bf16 %v1325_v60, %v1324_v59  ;;  %v1328_v5 = vld [vmem:[%s5079_s13 + $0x30] sm:$0xff]  ;;  %v1329_v6 = vld [vmem:[%s5079_s13 + $0x38] sm:$0xff]  ;;  %s4684_s5 = scalar_lea.vmem %s4683_s27, 4096  ;;  %p4685_p6 = scmp.lt.s32.totalorder %s5645_s8, %s4683_s27 }
  0xa8   : > { %v4258_v63 = vld [vmem:[%s5093_s18] sm:$0xff]   ;;  %v1327_v2 = vld [vmem:[%s5079_s13 + $0x28] sm:$0xff]  ;;  %v1341_v7 = vpack.c.bf16 %v1329_v6, %v1328_v5  ;;  %v4260_v8 = vld [vmem:[%s5093_s18 + $0x10] sm:$0xff]   ;;  %p4681_p7 = pneg %p4680_p2  ;;  %p4686_p9 = scmp.lt.s32.totalorder %s4684_s5, %s4678_s7 }
  0xa9   : > { %v1326_v1 = vld [vmem:[%s5079_s13 + $0x20] sm:$0xff]  ;;  %v4259_v4 = vld [vmem:[%s5093_s18 + $0x8] sm:$0xff]  }
  0xaa   : > { %4048 = vmatpush1.bf16.msra.mxu1 %v4195_v12  ;;  %723 = vmatpush1.bf16.msra.mxu0 %v4195_v12  ;;  %v1340_v3 = vpack.c.bf16 %v1327_v2, %v1326_v1  ;;  %v1330_v9 = vld [vmem:[%s5079_s13 + $0x40] sm:$0xff]  ;;  %v1331_v10 = vld [vmem:[%s5079_s13 + $0x48] sm:$0xff]  ;;  %v4261_v12 = vld [vmem:[%s5093_s18 + $0x18] sm:$0xff]   ;;  %p4687_p12 = por %p4686_p9, %p4685_p6 }
  0xab   : > { %4041 = vmatprep.subr.bf16.mxu1 %v4196_v13  ;;  %724 = vmatprep.subr.bf16.mxu0 %v4196_v13  ;;  %v1342_v11 = vpack.c.bf16 %v1331_v10, %v1330_v9  ;;  %v1332_v13 = vld [vmem:[%s5079_s13 + $0x50] sm:$0xff] }
  0xac   : > { %p4688_p13 = pnand %p4687_p12, %p4681_p7 }
  0xae   : > { %4049 = vmatpush1.bf16.msra.mxu1 %v4198_v14  ;;  %725 = vmatpush1.bf16.msra.mxu0 %v4198_v14  ;;  %v1333_v14 = vld [vmem:[%s5079_s13 + $0x58] sm:$0xff] }
  0xaf   : > { %4042 = vmatprep.subr.bf16.mxu1 %v4199_v15  ;;  %726 = vmatprep.subr.bf16.mxu0 %v4199_v15  ;;  %v1343_v15 = vpack.c.bf16 %v1333_v14, %v1332_v13 }
  0xb2   : > { %4050 = vmatpush1.bf16.msra.mxu1 %v4201_v16  ;;  %727 = vmatpush1.bf16.msra.mxu0 %v4201_v16  ;;  %v4262_v16 = vld [vmem:[%s5093_s18 + $0x20] sm:$0xff]  }
  0xb3   : > { %1442 = vmatprep.subr.bf16.mxu0 %v4209_v17  ;;  %1097 = vmatprep.subr.bf16.mxu1 %v4236_v24  ;;  %v1334_v17 = vld [vmem:[%s5079_s13 + $0x60] sm:$0xff]  ;;  %v4264_v24 = vld [vmem:[%s5093_s18 + $0x30] sm:$0xff]  }
  0xb5   : > { %785 = vmatmul.mubr.bf16.vlgmr.msra.gmra.mxu1 %v4202_v18  ;;  %745 = vmatmul.mubr.bf16.vlgmr.msra.gmra.mxu0 %v4206_v19  ;;  %v1335_v18 = vld [vmem:[%s5079_s13 + $0x68] sm:$0xff] }
  0xb6   : > { %794 = vmatprep.mubr.bf16.mxu1 %v4813_v0  ;;  %1443 = vmatpush1.bf16.msra.mxu0 %v4207_v20  ;;  %v1344_v19 = vpack.c.bf16 %v1335_v18, %v1334_v17  ;;  %v4263_v20 = vld [vmem:[%s5093_s18 + $0x28] sm:$0xff]  }
  0xb7   : > { %754 = vmatprep.mubr.bf16.mxu0 %v4813_v0  ;;  %1444 = vmatprep.subr.bf16.mxu0 %v4213_v21  ;;  %v1336_v21 = vld [vmem:[%s5079_s13 + $0x70] sm:$0xff] }
  0xb8   : > { %1098 = vmatpush1.bf16.msra.mxu1 %v4234_v23 }
  0xb9   : > { %1099 = vmatprep.subr.bf16.mxu1 %v4239_v26 }
  0xba   : > { %1445 = vmatpush1.bf16.msra.mxu0 %v4211_v22  ;;  %v1337_v22 = vld [vmem:[%s5079_s13 + $0x78] sm:$0xff] }
  0xbb   : > { %1446 = vmatprep.subr.bf16.mxu0 %v4216_v25  ;;  %v1345_v23 = vpack.c.bf16 %v1337_v22, %v1336_v21  ;;  %v4265_v25 = vld [vmem:[%s5093_s18 + $0x38] sm:$0xff]  }
  0xbc   : > { %1100 = vmatpush1.bf16.msra.mxu1 %v4237_v31 }
  0xbd   : > { %795 = vmatmul.mubr.bf16.gmra.mxu1 %v4203_v27  ;;  %755 = vmatmul.mubr.bf16.gmra.mxu0 %v4210_v28 }
  0xbe   : > { %804 = vmatprep.mubr.bf16.mxu1 %v4813_v0  ;;  %1447 = vmatpush1.bf16.msra.mxu0 %v4214_v29 }
  0xbf   : > { %764 = vmatprep.mubr.bf16.mxu0 %v4813_v0  ;;  %1448 = vmatprep.subr.bf16.mxu0 %v4220_v30 }
  0xc0   : > { %1101 = vmatprep.subr.bf16.mxu1 %v4242_v32 }
  0xc1   : > { %1102 = vmatpush1.bf16.msra.mxu1 %v4240_v36 }
  0xc2   : > { %1449 = vmatpush1.bf16.msra.mxu0 %v4218_v33  ;;  %1103 = vmatprep.subr.bf16.mxu1 %v4245_v41 }
  0xc3   : > { %1450 = vmatprep.subr.bf16.mxu0 %v4223_v35 }
  0xc5   : > { %805 = vmatmul.mubr.bf16.gmra.mxu1 %v4204_v34  ;;  %765 = vmatmul.mubr.bf16.gmra.mxu0 %v4217_v37 }
  0xc6   : > { %814 = vmatprep.mubr.bf16.mxu1 %v4813_v0  ;;  %1451 = vmatpush1.bf16.msra.mxu0 %v4221_v38 }
  0xc7   : > { %774 = vmatprep.mubr.bf16.mxu0 %v4813_v0  ;;  %1452 = vmatprep.subr.bf16.mxu0 %v4227_v39 }
  0xc8   : > { %1104 = vmatpush1.bf16.msra.mxu1 %v4243_v43 }
  0xc9   : > { %1105 = vmatprep.subr.bf16.mxu1 %v4248_v44 }
  0xca   : > { %1453 = vmatpush1.bf16.msra.mxu0 %v4225_v40 }
  0xcb   : > { %1454 = vmatprep.subr.bf16.mxu0 %v4230_v42 }
  0xcc   : > { %1106 = vmatpush1.bf16.msra.mxu1 %v4246_v49 }
  0xcd   : > { %815 = vmatmul.mubr.bf16.gmra.mxu1 %v4205_v45  ;;  %775 = vmatmul.mubr.bf16.gmra.mxu0 %v4224_v46 }
  0xce   : > { %1455 = vmatpush1.bf16.msra.mxu0 %v4228_v47  ;;  %1474 = vmatprep.mubr.bf16.mxu0 %v4813_v0 }
  0xcf   : > { %1456 = vmatprep.subr.bf16.mxu0 %v4233_v48  ;;  %1107 = vmatprep.subr.bf16.mxu1 %v4251_v50 }
  0xd0   : > { %1129 = vmatprep.mubr.bf16.mxu1 %v4813_v0  ;;  %1108 = vmatpush1.bf16.msra.mxu1 %v4249_v54 }
  0xd1   : > { %1109 = vmatprep.subr.bf16.mxu1 %v4254_v55 }
  0xd2   : > { %1457 = vmatpush1.bf16.msra.mxu0 %v4231_v51 }
  0xd4   : > { %1110 = vmatpush1.bf16.msra.mxu1 %v4252_v57 }
  0xd5   : > { %1475 = vmatmul.mubr.bf16.vlgmr.msra.gmra.mxu0 %v1338_v56  ;;  %1111 = vmatprep.subr.bf16.mxu1 %v4257_v58 }
  0xd6   : > { %1484 = vmatprep.mubr.bf16.mxu0 %v4813_v0 }
  0xd8   : > { %1112 = vmatpush1.bf16.msra.mxu1 %v4255_v61 }
  0xdb   : > { %1130 = vmatmul.mubr.bf16.vlgmr.msra.gmra.mxu1 %v4258_v63 }
  0xdc   : > { %1139 = vmatprep.mubr.bf16.mxu1 %v4813_v0 }
  0xdd   : > { %1485 = vmatmul.mubr.bf16.gmra.mxu0 %v1339_v62 }
  0xde   : > { %1494 = vmatprep.mubr.bf16.mxu0 %v4813_v0 }
  0xe3   : > { %1140 = vmatmul.mubr.bf16.gmra.mxu1 %v4259_v4 }
  0xe4   : > { %1149 = vmatprep.mubr.bf16.mxu1 %v4813_v0 }
  0xe5   : > { %1495 = vmatmul.mubr.bf16.gmra.mxu0 %v1340_v3 }
  0xe6   : > { %1504 = vmatprep.mubr.bf16.mxu0 %v4813_v0 }
  0xeb   : > { %1150 = vmatmul.mubr.bf16.gmra.mxu1 %v4260_v8 }
  0xec   : > { %1159 = vmatprep.mubr.bf16.mxu1 %v4813_v0 }
  0xed   : > { %1505 = vmatmul.mubr.bf16.gmra.mxu0 %v1341_v7 }
  0xee   : > { %1514 = vmatprep.mubr.bf16.mxu0 %v4813_v0 }
  0xf3   : > { %1160 = vmatmul.mubr.bf16.gmra.mxu1 %v4261_v12 }
  0xf4   : > { %1169 = vmatprep.mubr.bf16.mxu1 %v4813_v0 }
  0xf5   : > { %1515 = vmatmul.mubr.bf16.gmra.mxu0 %v1342_v11 }
  0xf6   : > { %1524 = vmatprep.mubr.bf16.mxu0 %v4813_v0 }
  0xfb   : > { %1170 = vmatmul.mubr.bf16.gmra.mxu1 %v4262_v16 }
  0xfc   : > { %1179 = vmatprep.mubr.bf16.mxu1 %v4813_v0 }
  0xfd   : > { %1525 = vmatmul.mubr.bf16.gmra.mxu0 %v1343_v15 }
  0xfe   : > { %1534 = vmatprep.mubr.bf16.mxu0 %v4813_v0 }
 0x103   : > { %1180 = vmatmul.mubr.bf16.gmra.mxu1 %v4263_v20 }
 0x104   : > { %1189 = vmatprep.mubr.bf16.mxu1 %v4813_v0 }
 0x105   : > { %1535 = vmatmul.mubr.bf16.gmra.mxu0 %v1344_v19 }
 0x106   : > { %1544 = vmatprep.mubr.bf16.mxu0 %v4813_v0 }
 0x10b   : > { %1190 = vmatmul.mubr.bf16.gmra.mxu1 %v4264_v24 }
 0x10c   : > { %1199 = vmatprep.mubr.bf16.mxu1 %v4813_v0 }
 0x10d   : > { %1545 = vmatmul.mubr.bf16.gmra.mxu0 %v1345_v23 }
 0x113   : > { %1200 = vmatmul.mubr.bf16.gmra.mxu1 %v4265_v25 }
 0x175   : > { %v786_v26 = vpop.f32.mrf.mxu1  ;;  %v746_v27 = vpop.f32.mrf.mxu0 }
 0x177   : > { %v788_v28 = vpop.f32.mrf.mxu1  ;;  %v748_v29 = vpop.f32.mrf.mxu0 }
 0x178   : > { %v3626_v30 = vpack.c.bf16 %v788_v28, %v786_v26  ;;  %v3618_v31 = vpack.c.bf16 %v748_v29, %v746_v27 }
 0x179   : > { %v790_v32 = vpop.f32.mrf.mxu1  ;;  %v750_v33 = vpop.f32.mrf.mxu0 }
 0x17a   : > { %929 = vst [vmem:[#allocation2 + $0x40] sm:$0xff] %v3626_v30  ;;  %921 = vst [vmem:[#allocation2] sm:$0xff] %v3618_v31 }
 0x17b   : > { %v792_v34 = vpop.f32.mrf.mxu1  ;;  %v752_v35 = vpop.f32.mrf.mxu0 }
 0x17c   : > { %v3627_v36 = vpack.c.bf16 %v792_v34, %v790_v32  ;;  %v3619_v37 = vpack.c.bf16 %v752_v35, %v750_v33 }
 0x17d   : > { %v796_v38 = vpop.f32.mrf.mxu1  ;;  %v756_v39 = vpop.f32.mrf.mxu0 }
 0x17e   : > { %930 = vst [vmem:[#allocation2 + $0x48] sm:$0xff] %v3627_v36  ;;  %922 = vst [vmem:[#allocation2 + $0x8] sm:$0xff] %v3619_v37 }
 0x17f   : > { %v798_v0 = vpop.f32.mrf.mxu1  ;;  %v758_v40 = vpop.f32.mrf.mxu0 }
 0x180   : > { %v3628_v41 = vpack.c.bf16 %v798_v0, %v796_v38  ;;  %v3620_v42 = vpack.c.bf16 %v758_v40, %v756_v39 }
 0x181   : > { %v800_v43 = vpop.f32.mrf.mxu1  ;;  %v760_v44 = vpop.f32.mrf.mxu0 }
 0x182   : > { %931 = vst [vmem:[#allocation2 + $0x50] sm:$0xff] %v3628_v41  ;;  %923 = vst [vmem:[#allocation2 + $0x10] sm:$0xff] %v3620_v42 }
 0x183   : > { %v802_v45 = vpop.f32.mrf.mxu1  ;;  %v762_v46 = vpop.f32.mrf.mxu0 }
 0x184   : > { %v3629_v47 = vpack.c.bf16 %v802_v45, %v800_v43  ;;  %v3621_v48 = vpack.c.bf16 %v762_v46, %v760_v44 }
 0x185   : > { %v806_v49 = vpop.f32.mrf.mxu1  ;;  %v766_v50 = vpop.f32.mrf.mxu0  ;;  %v4272_v43 = vld [vmem:[#allocation2 + $0x40] ss:$8 sps:$4 sm:$0xff]   ;;  %v4273_v45 = vld [vmem:[#allocation2 + $0x44] ss:$8 sps:$4 sm:$0xff]  }
 0x186   : > { %932 = vst [vmem:[#allocation2 + $0x58] sm:$0xff] %v3629_v47  ;;  %924 = vst [vmem:[#allocation2 + $0x18] sm:$0xff] %v3621_v48 }
 0x187   : > { %v808_v51 = vpop.f32.mrf.mxu1  ;;  %v768_v52 = vpop.f32.mrf.mxu0 }
 0x188   : > { %v3630_v53 = vpack.c.bf16 %v808_v51, %v806_v49  ;;  %v3622_v54 = vpack.c.bf16 %v768_v52, %v766_v50 }
 0x189   : > { %v810_v55 = vpop.f32.mrf.mxu1  ;;  %v770_v56 = vpop.f32.mrf.mxu0 }
 0x18a   : > { %933 = vst [vmem:[#allocation2 + $0x60] sm:$0xff] %v3630_v53  ;;  %925 = vst [vmem:[#allocation2 + $0x20] sm:$0xff] %v3622_v54 }
 0x18b   : > { %v812_v57 = vpop.f32.mrf.mxu1  ;;  %v772_v58 = vpop.f32.mrf.mxu0 }
 0x18c   : > { %v3631_v59 = vpack.c.bf16 %v812_v57, %v810_v55  ;;  %v3623_v60 = vpack.c.bf16 %v772_v58, %v770_v56 }
 0x18d   : > { %v816_v61 = vpop.f32.mrf.mxu1  ;;  %v776_v62 = vpop.f32.mrf.mxu0  ;;  %v4270_v32 = vld [vmem:[#allocation2 + $0x50] ss:$8 sps:$4 sm:$0xff]   ;;  %v4271_v34 = vld [vmem:[#allocation2 + $0x54] ss:$8 sps:$4 sm:$0xff]  }
 0x18e   : > { %934 = vst [vmem:[#allocation2 + $0x68] sm:$0xff] %v3631_v59  ;;  %926 = vst [vmem:[#allocation2 + $0x28] sm:$0xff] %v3623_v60 }
 0x18f   : > { %v818_v63 = vpop.f32.mrf.mxu1  ;;  %v778_v1 = vpop.f32.mrf.mxu0 }
 0x190   : > { %v3632_v2 = vpack.c.bf16 %v818_v63, %v816_v61  ;;  %v3624_v3 = vpack.c.bf16 %v778_v1, %v776_v62 }
 0x191   : > { %v820_v4 = vpop.f32.mrf.mxu1  ;;  %v780_v5 = vpop.f32.mrf.mxu0 }
 0x192   : > { %935 = vst [vmem:[#allocation2 + $0x70] sm:$0xff] %v3632_v2  ;;  %927 = vst [vmem:[#allocation2 + $0x30] sm:$0xff] %v3624_v3 }
 0x193   : > { %v822_v6 = vpop.f32.mrf.mxu1  ;;  %v782_v7 = vpop.f32.mrf.mxu0 }
 0x194   : > { %v3633_v8 = vpack.c.bf16 %v822_v6, %v820_v4  ;;  %v3625_v9 = vpack.c.bf16 %v782_v7, %v780_v5 }
 0x195   : > { %v1476_v10 = vpop.f32.mrf.mxu0  ;;  %v4268_v20 = vld [vmem:[#allocation2 + $0x60] ss:$8 sps:$4 sm:$0xff]   ;;  %v4269_v22 = vld [vmem:[#allocation2 + $0x64] ss:$8 sps:$4 sm:$0xff]  }
 0x196   : > { %936 = vst [vmem:[#allocation2 + $0x78] sm:$0xff] %v3633_v8  ;;  %928 = vst [vmem:[#allocation2 + $0x38] sm:$0xff] %v3625_v9  ;;  %v4276_v1 = vld [vmem:[#allocation2 + $0x20] ss:$8 sps:$4 sm:$0xff]   ;;  %v4277_v3 = vld [vmem:[#allocation2 + $0x24] ss:$8 sps:$4 sm:$0xff]  }
 0x197   : > { %v1478_v11 = vpop.f32.mrf.mxu0 }
 0x199   : > { %v1480_v12 = vpop.f32.mrf.mxu0 }
 0x19a   : > { %v1555_v13 = vpack.c.bf16 %v1480_v12, %v1476_v10 }
 0x19b   : > { %v1482_v14 = vpop.f32.mrf.mxu0  ;;  %v1131_v19 = vpop.f32.mrf.mxu1 }
 0x19c   : > { %v2109_v15 = vpack.c.bf16 %v1482_v14, %v1478_v11  ;;  %3923 = vmatprep.mubr.bf16.mxu1 %v1555_v13  ;;  %v4278_v11 = vld [vmem:[#allocation2 + $0x10] ss:$8 sps:$4 sm:$0xff]   ;;  %v4279_v13 = vld [vmem:[#allocation2 + $0x14] ss:$8 sps:$4 sm:$0xff]  }
 0x19d   : > { %v4266_v16 = vld [vmem:[#allocation2 + $0x70] ss:$8 sps:$4 sm:$0xff]   ;;  %v5159_v17 = vpop.f32.mrf.mxu0  ;;  %v4267_v18 = vld [vmem:[#allocation2 + $0x74] ss:$8 sps:$4 sm:$0xff]   ;;  %v1133_v23 = vpop.f32.mrf.mxu1 }
 0x19e   : > { %3987 = vmatprep.mubr.bf16.mxu0 %v2109_v15  ;;  %3907 = vmatprep.subr.bf16.mxu1 %v4266_v16  ;;  %v3634_v25 = vpack.c.bf16 %v1133_v23, %v1131_v19  ;;  %v4274_v52 = vld [vmem:[#allocation2 + $0x30] ss:$8 sps:$4 sm:$0xff]   ;;  %v4275_v54 = vld [vmem:[#allocation2 + $0x34] ss:$8 sps:$4 sm:$0xff]   ;;  %v4280_v23 = vld [vmem:[#allocation2] ss:$8 sps:$4 sm:$0xff]  }
 0x19f   : > { %v5161_v21 = vpop.f32.mrf.mxu0  ;;  %3971 = vmatprep.subr.bf16.mxu0 %v4267_v18  ;;  %3908 = vmatpush3.bf16.xpose.msra.mxu1 %v4266_v16  ;;  %v1135_v26 = vpop.f32.mrf.mxu1 }
 0x1a0   : > { %3972 = vmatpush3.bf16.xpose.msra.mxu0 %v4267_v18  ;;  %3909 = vmatprep.subr.bf16.mxu1 %v4268_v20  ;;  %1306 = vst [vmem:[#allocation3] sm:$0xff] %v3634_v25 }
 0x1a1   : > { %v5163_v24 = vpop.f32.mrf.mxu0  ;;  %3973 = vmatprep.subr.bf16.mxu0 %v4269_v22  ;;  %v1137_v28 = vpop.f32.mrf.mxu1 }
 0x1a2   : > { %v3635_v30 = vpack.c.bf16 %v1137_v28, %v1135_v26  ;;  %v4281_v26 = vld [vmem:[#allocation2 + $0x4] ss:$8 sps:$4 sm:$0xff]  }
 0x1a3   : > { %v5165_v27 = vpop.f32.mrf.mxu0  ;;  %v1141_v31 = vpop.f32.mrf.mxu1 }
 0x1a4   : > { %1307 = vst [vmem:[#allocation3 + $0x8] sm:$0xff] %v3635_v30 }
 0x1a5   : > { %v5167_v29 = vpop.f32.mrf.mxu0  ;;  %v1143_v35 = vpop.f32.mrf.mxu1 }
 0x1a6   : > { %v3636_v37 = vpack.c.bf16 %v1143_v35, %v1141_v31 }
 0x1a7   : > { %v5169_v33 = vpop.f32.mrf.mxu0  ;;  %3910 = vmatpush3.bf16.xpose.msra.mxu1 %v4268_v20  ;;  %v1145_v38 = vpop.f32.mrf.mxu1 }
 0x1a8   : > { %3974 = vmatpush3.bf16.xpose.msra.mxu0 %v4269_v22  ;;  %3911 = vmatprep.subr.bf16.mxu1 %v4270_v32  ;;  %1308 = vst [vmem:[#allocation3 + $0x10] sm:$0xff] %v3636_v37 }
 0x1a9   : > { %v5171_v36 = vpop.f32.mrf.mxu0  ;;  %3975 = vmatprep.subr.bf16.mxu0 %v4271_v34  ;;  %v1147_v0 = vpop.f32.mrf.mxu1 }
 0x1aa   : > { %v3637_v41 = vpack.c.bf16 %v1147_v0, %v1145_v38 }
 0x1ab   : > { %v5173_v39 = vpop.f32.mrf.mxu0  ;;  %v1151_v42 = vpop.f32.mrf.mxu1 }
 0x1ac   : > { %1309 = vst [vmem:[#allocation3 + $0x18] sm:$0xff] %v3637_v41 }
 0x1ad   : > { %v5175_v40 = vpop.f32.mrf.mxu0  ;;  %v1153_v46 = vpop.f32.mrf.mxu1 }
 0x1ae   : > { %v3638_v48 = vpack.c.bf16 %v1153_v46, %v1151_v42  ;;  %v1556_v46 = vpack.c.bf16 %v5163_v24, %v5159_v17 }
 0x1af   : > { %v5177_v44 = vpop.f32.mrf.mxu0  ;;  %3912 = vmatpush3.bf16.xpose.msra.mxu1 %v4270_v32  ;;  %v1155_v49 = vpop.f32.mrf.mxu1 }
 0x1b0   : > { %3976 = vmatpush3.bf16.xpose.msra.mxu0 %v4271_v34  ;;  %3913 = vmatprep.subr.bf16.mxu1 %v4272_v43  ;;  %1310 = vst [vmem:[#allocation3 + $0x20] sm:$0xff] %v3638_v48 }
 0x1b1   : > { %v5179_v47 = vpop.f32.mrf.mxu0  ;;  %3977 = vmatprep.subr.bf16.mxu0 %v4273_v45  ;;  %v1157_v51 = vpop.f32.mrf.mxu1 }
 0x1b2   : > { %v3639_v53 = vpack.c.bf16 %v1157_v51, %v1155_v49  ;;  %v2110_v49 = vpack.c.bf16 %v5165_v27, %v5161_v21  ;;  %v1557_v51 = vpack.c.bf16 %v5171_v36, %v5167_v29  ;;  %v1558_v17 = vpack.c.bf16 %v5179_v47, %v5175_v40 }
 0x1b3   : > { %v5181_v50 = vpop.f32.mrf.mxu0  ;;  %v1161_v55 = vpop.f32.mrf.mxu1 }
 0x1b4   : > { %1311 = vst [vmem:[#allocation3 + $0x28] sm:$0xff] %v3639_v53  ;;  %v2112_v24 = vpack.c.bf16 %v5181_v50, %v5177_v44 }
 0x1b5   : > { %v5183_v56 = vpop.f32.mrf.mxu0  ;;  %v1163_v57 = vpop.f32.mrf.mxu1 }
 0x1b6   : > { %v3640_v58 = vpack.c.bf16 %v1163_v57, %v1161_v55 }
 0x1b7   : > { %3914 = vmatpush3.bf16.xpose.msra.mxu1 %v4272_v43  ;;  %v1165_v59 = vpop.f32.mrf.mxu1  ;;  %v5185_v60 = vpop.f32.mrf.mxu0 }
 0x1b8   : > { %3978 = vmatpush3.bf16.xpose.msra.mxu0 %v4273_v45  ;;  %3915 = vmatprep.subr.bf16.mxu1 %v4274_v52  ;;  %1312 = vst [vmem:[#allocation3 + $0x30] sm:$0xff] %v3640_v58 }
 0x1b9   : > { %3979 = vmatprep.subr.bf16.mxu0 %v4275_v54  ;;  %v1167_v61 = vpop.f32.mrf.mxu1  ;;  %v5187_v2 = vpop.f32.mrf.mxu0 }
 0x1ba   : > { %v3641_v62 = vpack.c.bf16 %v1167_v61, %v1165_v59  ;;  %v1559_v21 = vpack.c.bf16 %v5187_v2, %v5183_v56 }
 0x1bb   : > { %v1171_v63 = vpop.f32.mrf.mxu1  ;;  %v5189_v7 = vpop.f32.mrf.mxu0 }
 0x1bc   : > { %1313 = vst [vmem:[#allocation3 + $0x38] sm:$0xff] %v3641_v62  ;;  %v2113_v29 = vpack.c.bf16 %v5189_v7, %v5185_v60  ;;  %v4287_v62 = vld [vmem:[#allocation3 + $0x20] ss:$8 sps:$4 sm:$0xff]  }
 0x1bd   : > { %v1173_v4 = vpop.f32.mrf.mxu1  ;;  %v5191_v12 = vpop.f32.mrf.mxu0 }
 0x1be   : > { %v3642_v5 = vpack.c.bf16 %v1173_v4, %v1171_v63  ;;  %v4288_v63 = vld [vmem:[#allocation3 + $0x10] ss:$8 sps:$4 sm:$0xff]  }
 0x1bf   : > { %3916 = vmatpush3.bf16.xpose.msra.mxu1 %v4274_v52  ;;  %v1175_v6 = vpop.f32.mrf.mxu1  ;;  %v5193_v18 = vpop.f32.mrf.mxu0  ;;  %v2111_v52 = vpack.c.bf16 %v5173_v39, %v5169_v33 }
 0x1c0   : > { %3980 = vmatpush3.bf16.xpose.msra.mxu0 %v4275_v54  ;;  %3917 = vmatprep.subr.bf16.mxu1 %v4276_v1  ;;  %1314 = vst [vmem:[#allocation3 + $0x40] sm:$0xff] %v3642_v5 }
 0x1c1   : > { %3981 = vmatprep.subr.bf16.mxu0 %v4277_v3  ;;  %v1177_v8 = vpop.f32.mrf.mxu1  ;;  %v1530_v25 = vpop.f32.mrf.mxu0 }
 0x1c2   : > { %v3643_v9 = vpack.c.bf16 %v1177_v8, %v1175_v6  ;;  %v1560_v44 = vpack.c.bf16 %v1530_v25, %v5191_v12 }
 0x1c3   : > { %v1181_v10 = vpop.f32.mrf.mxu1  ;;  %v1532_v32 = vpop.f32.mrf.mxu0  ;;  %v4286_v59 = vld [vmem:[#allocation3 + $0x30] ss:$8 sps:$4 sm:$0xff]  }
 0x1c4   : > { %1315 = vst [vmem:[#allocation3 + $0x48] sm:$0xff] %v3643_v9  ;;  %v2114_v47 = vpack.c.bf16 %v1532_v32, %v5193_v18 }
 0x1c5   : > { %v1183_v14 = vpop.f32.mrf.mxu1  ;;  %v1536_v38 = vpop.f32.mrf.mxu0 }
 0x1c6   : > { %v3644_v15 = vpack.c.bf16 %v1183_v14, %v1181_v10 }
 0x1c7   : > { %3918 = vmatpush3.bf16.xpose.msra.mxu1 %v4276_v1  ;;  %v1185_v16 = vpop.f32.mrf.mxu1  ;;  %v1538_v43 = vpop.f32.mrf.mxu0  ;;  %v4289_v1 = vld [vmem:[#allocation3] ss:$8 sps:$4 sm:$0xff]  }
 0x1c8   : > { %3982 = vmatpush3.bf16.xpose.msra.mxu0 %v4277_v3  ;;  %3919 = vmatprep.subr.bf16.mxu1 %v4278_v11  ;;  %1316 = vst [vmem:[#allocation3 + $0x50] sm:$0xff] %v3644_v15 }
 0x1c9   : > { %3983 = vmatprep.subr.bf16.mxu0 %v4279_v13  ;;  %v1187_v19 = vpop.f32.mrf.mxu1  ;;  %v1540_v53 = vpop.f32.mrf.mxu0 }
 0x1ca   : > { %v3645_v20 = vpack.c.bf16 %v1187_v19, %v1185_v16  ;;  %v1561_v50 = vpack.c.bf16 %v1540_v53, %v1536_v38 }
 0x1cb   : > { %v1191_v22 = vpop.f32.mrf.mxu1  ;;  %v1542_v54 = vpop.f32.mrf.mxu0  ;;  %v4285_v57 = vld [vmem:[#allocation3 + $0x40] ss:$8 sps:$4 sm:$0xff]  }
 0x1cc   : > { %1317 = vst [vmem:[#allocation3 + $0x58] sm:$0xff] %v3645_v20  ;;  %v2115_v55 = vpack.c.bf16 %v1542_v54, %v1538_v43 }
 0x1cd   : > { %v1193_v28 = vpop.f32.mrf.mxu1  ;;  %v1546_v33 = vpop.f32.mrf.mxu0 }
 0x1ce   : > { %v3646_v30 = vpack.c.bf16 %v1193_v28, %v1191_v22 }
 0x1cf   : > { %3920 = vmatpush3.bf16.xpose.msra.mxu1 %v4278_v11  ;;  %v1195_v31 = vpop.f32.mrf.mxu1  ;;  %v1548_v39 = vpop.f32.mrf.mxu0 }
 0x1d0   : > { %3984 = vmatpush3.bf16.xpose.msra.mxu0 %v4279_v13  ;;  %3921 = vmatprep.subr.bf16.mxu1 %v4280_v23  ;;  %1318 = vst [vmem:[#allocation3 + $0x60] sm:$0xff] %v3646_v30 }
 0x1d1   : > { %3985 = vmatprep.subr.bf16.mxu0 %v4281_v26  ;;  %v1197_v34 = vpop.f32.mrf.mxu1  ;;  %v1550_v56 = vpop.f32.mrf.mxu0 }
 0x1d2   : > { %v3647_v35 = vpack.c.bf16 %v1197_v34, %v1195_v31  ;;  %v1562_v60 = vpack.c.bf16 %v1550_v56, %v1546_v33 }
 0x1d3   : > { %v1201_v37 = vpop.f32.mrf.mxu1  ;;  %v4284_v40 = vld [vmem:[#allocation3 + $0x50] ss:$8 sps:$4 sm:$0xff]   ;;  %v1552_v58 = vpop.f32.mrf.mxu0 }
 0x1d4   : > { %1319 = vst [vmem:[#allocation3 + $0x68] sm:$0xff] %v3647_v35  ;;  %v2116_v61 = vpack.c.bf16 %v1552_v58, %v1548_v39 }
 0x1d5   : > { %v1203_v0 = vpop.f32.mrf.mxu1 }
 0x1d6   : > { %v3648_v41 = vpack.c.bf16 %v1203_v0, %v1201_v37 }
 0x1d7   : > { %3922 = vmatpush3.bf16.xpose.msra.mxu1 %v4280_v23  ;;  %v1205_v42 = vpop.f32.mrf.mxu1 }
 0x1d8   : > { %3986 = vmatpush3.bf16.xpose.msra.mxu0 %v4281_v26  ;;  %1320 = vst [vmem:[#allocation3 + $0x70] sm:$0xff] %v3648_v41 }
 0x1d9   : > { %v1207_v45 = vpop.f32.mrf.mxu1 }
 0x1da   : > { %v3649_v48 = vpack.c.bf16 %v1207_v45, %v1205_v42 }
 0x1db   : > { %v4283_v36 = vld [vmem:[#allocation3 + $0x60] ss:$8 sps:$4 sm:$0xff]  }
 0x1dc   : > { %1321 = vst [vmem:[#allocation3 + $0x78] sm:$0xff] %v3649_v48 }
 0x1de   : > { %3924 = vmatmul.mubr.bf16.vlgmr.msra.gmra.mxu1 %v1556_v46 }
 0x1df   : > { %3988 = vmatmul.mubr.bf16.vlgmr.msra.gmra.mxu0 %v2110_v49  ;;  %3927 = vmatprep.mubr.bf16.mxu1 %v1557_v51 }
 0x1e0   : > { %3991 = vmatprep.mubr.bf16.mxu0 %v2111_v52 }
 0x1e3   : > { %v4282_v27 = vld [vmem:[#allocation3 + $0x70] ss:$8 sps:$4 sm:$0xff]   ;;  %v5213_v2 = vld [vmem:[#allocation3 + $0x74] ss:$8 sps:$4 sm:$0xff]  }
 0x1e4   : > { %3939 = vmatprep.subr.bf16.mxu1 %v4282_v27 }
 0x1e5   : > { %3940 = vmatpush3.bf16.msra.mxu1 %v4282_v27 }
 0x1e6   : > { %3928 = vmatmul.mubr.bf16.gmra.mxu1 %v1558_v17  ;;  %3941 = vmatprep.subr.bf16.mxu1 %v4283_v36 }
 0x1e7   : > { %3992 = vmatmul.mubr.bf16.gmra.mxu0 %v2112_v24  ;;  %3931 = vmatprep.mubr.bf16.mxu1 %v1559_v21 }
 0x1e8   : > { %3995 = vmatprep.mubr.bf16.mxu0 %v2113_v29 }
 0x1e9   : > { %3942 = vmatpush3.bf16.msra.mxu1 %v4283_v36 }
 0x1ea   : > { %3943 = vmatprep.subr.bf16.mxu1 %v4284_v40 }
 0x1ed   : > { %3944 = vmatpush3.bf16.msra.mxu1 %v4284_v40 }
 0x1ee   : > { %3932 = vmatmul.mubr.bf16.gmra.mxu1 %v1560_v44  ;;  %3945 = vmatprep.subr.bf16.mxu1 %v4285_v57 }
 0x1ef   : > { %3996 = vmatmul.mubr.bf16.gmra.mxu0 %v2114_v47  ;;  %3935 = vmatprep.mubr.bf16.mxu1 %v1561_v50 }
 0x1f0   : > { %3999 = vmatprep.mubr.bf16.mxu0 %v2115_v55 }
 0x1f1   : > { %3946 = vmatpush3.bf16.msra.mxu1 %v4285_v57 }
 0x1f2   : > { %3947 = vmatprep.subr.bf16.mxu1 %v4286_v59 }
 0x1f5   : > { %3948 = vmatpush3.bf16.msra.mxu1 %v4286_v59 }
 0x1f6   : > { %3936 = vmatmul.mubr.bf16.gmra.mxu1 %v1562_v60  ;;  %3949 = vmatprep.subr.bf16.mxu1 %v4287_v62 }
 0x1f7   : > { %4000 = vmatmul.mubr.bf16.gmra.mxu0 %v2116_v61 }
 0x1f9   : > { %3950 = vmatpush3.bf16.msra.mxu1 %v4287_v62 }
 0x1fa   : > { %3951 = vmatprep.subr.bf16.mxu1 %v4288_v63 }
 0x1fd   : > { %3952 = vmatpush3.bf16.msra.mxu1 %v4288_v63 }
 0x1fe   : > { %3953 = vmatprep.subr.bf16.mxu1 %v4289_v1 }
 0x201   : > { %3954 = vmatpush3.bf16.msra.mxu1 %v4289_v1 }
 0x202   : > { %4003 = vmatprep.subr.bf16.mxu1 %v5213_v2 }
 0x29e   : > { %v5216_v3 = vpop.f32.mrf.mxu1 }
 0x29f   : > { %1744 = vmax.xlane.f32.xlu1 %v5216_v3  ;;  %v5219_v4 = vpop.f32.mrf.mxu0 }
 0x2a0   : > { %v5221_v5 = vpop.f32.mrf.mxu1 }
 0x2a1   : > { %1740 = vmax.xlane.f32.xlu0 %v5221_v5  ;;  %v5227_v7 = vpop.f32.mrf.mxu0 }
 0x2a2   : > { %v5224_v6 = vpop.f32.mrf.mxu1 }
 0x2a3   : > { %1746 = vmax.xlane.f32.xlu1 %v5224_v6  ;;  %v5234_v10 = vpop.f32.mrf.mxu0 }
 0x2a4   : > { %v5229_v8 = vpop.f32.mrf.mxu1 }
 0x2a5   : > { %1742 = vmax.xlane.f32.xlu0 %v5229_v8  ;;  %v5241_v13 = vpop.f32.mrf.mxu0 }
 0x2a6   : > { %v5232_v9 = vpop.f32.mrf.mxu1 }
 0x2a7   : > { %v5249_v16 = vpop.f32.mrf.mxu0 }
 0x2a8   : > { %v5236_v11 = vpop.f32.mrf.mxu1 }
 0x2a9   : > { %1748 = vmax.xlane.f32.xlu0 %v5236_v11  ;;  %v5257_v20 = vpop.f32.mrf.mxu0 }
 0x2aa   : > { %v5239_v12 = vpop.f32.mrf.mxu1 }
 0x2ab   : > { %v5265_v25 = vpop.f32.mrf.mxu0 }
 0x2ac   : > { %v5243_v14 = vpop.f32.mrf.mxu1 }
 0x2ad   : > { %1752 = vmax.xlane.f32.xlu0 %v5232_v9  ;;  %1750 = vmax.xlane.f32.xlu1 %v5243_v14  ;;  %v5273_v30 = vpop.f32.mrf.mxu0 }
 0x2ae   : > { %v5247_v15 = vpop.f32.mrf.mxu1 }
 0x2af   : > { %v5279_v32 = vpop.f32.mrf.mxu0 }
 0x2b0   : > { %v5251_v18 = vpop.f32.mrf.mxu1 }
 0x2b1   : > { %1754 = vmax.xlane.f32.xlu1 %v5239_v12  ;;  %1756 = vmax.xlane.f32.xlu0 %v5251_v18  ;;  %v5283_v34 = vpop.f32.mrf.mxu0 }
 0x2b2   : > { %v5255_v19 = vpop.f32.mrf.mxu1 }
 0x2b3   : > { %v5287_v35 = vpop.f32.mrf.mxu0 }
 0x2b4   : > { %v5259_v22 = vpop.f32.mrf.mxu1 }
 0x2b5   : > { %1760 = vmax.xlane.f32.xlu0 %v5247_v15  ;;  %1758 = vmax.xlane.f32.xlu1 %v5259_v22  ;;  %v5291_v37 = vpop.f32.mrf.mxu0 }
 0x2b6   : > { %v5263_v23 = vpop.f32.mrf.mxu1 }
 0x2b7   : > { %v5295_v38 = vpop.f32.mrf.mxu0 }
 0x2b8   : > { %v5267_v26 = vpop.f32.mrf.mxu1 }
 0x2b9   : > { %1762 = vmax.xlane.f32.xlu1 %v5255_v19  ;;  %1764 = vmax.xlane.f32.xlu0 %v5267_v26  ;;  %v5299_v0 = vpop.f32.mrf.mxu0 }
 0x2ba   : > { %v5271_v28 = vpop.f32.mrf.mxu1 }
 0x2bb   : > { %v5303_v41 = vpop.f32.mrf.mxu0 }
 0x2bc   : > { %v5275_v31 = vpop.f32.mrf.mxu1 }
 0x2bd   : > { %1768 = vmax.xlane.f32.xlu0 %v5263_v23  ;;  %1766 = vmax.xlane.f32.xlu1 %v5275_v31  ;;  %v5307_v42 = vpop.f32.mrf.mxu0 }
 0x2c1   : > { %2294 = vmax.xlane.f32.xlu0 %v5227_v7  ;;  %1770 = vmax.xlane.f32.xlu1 %v5271_v28 }
 0x2c5   : > { %2298 = vmax.xlane.f32.xlu0 %v5219_v4  ;;  %2296 = vmax.xlane.f32.xlu1 %v5241_v13 }
 0x2c9   : > { %2302 = vmax.xlane.f32.xlu0 %v5257_v20  ;;  %2300 = vmax.xlane.f32.xlu1 %v5234_v10 }
 0x2cd   : > { %2306 = vmax.xlane.f32.xlu0 %v5249_v16  ;;  %2304 = vmax.xlane.f32.xlu1 %v5273_v30 }
 0x2d1   : > { %2310 = vmax.xlane.f32.xlu0 %v5283_v34  ;;  %2308 = vmax.xlane.f32.xlu1 %v5265_v25 }
 0x2d5   : > { %2314 = vmax.xlane.f32.xlu0 %v5279_v32  ;;  %2312 = vmax.xlane.f32.xlu1 %v5291_v37 }
 0x2d9   : > { %2318 = vmax.xlane.f32.xlu0 %v5299_v0  ;;  %2316 = vmax.xlane.f32.xlu1 %v5287_v35 }
 0x2dd   : > { %2322 = vmax.xlane.f32.xlu0 %v5295_v38  ;;  %2320 = vmax.xlane.f32.xlu1 %v5307_v42 }
 0x2e1   : > { %2324 = vmax.xlane.f32.xlu1 %v5303_v41 }
 0x328   : > { %v1745_v43 = vpop.xlane.xlu1 %1744 }
 0x329   : > { %v1774_v45 = vsub.f32 %v5216_v3, %v1745_v43 }
 0x32a   : > { %v1741_v46 = vpop.xlane.xlu0 %1740 }
 0x32b   : > { %v1772_v48 = vsub.f32 %v5221_v5, %v1741_v46  ;;  %v1792_v52 = vmul.f32 1.442695, %v1774_v45 }
 0x32c   : > { %v1747_v49 = vpop.xlane.xlu1 %1746 }
 0x32d   : > { %v1788_v51 = vmul.f32 1.442695, %v1772_v48  ;;  %v1775_v53 = vsub.f32 %v5224_v6, %v1747_v49 }
 0x32e   : > { %v1743_v54 = vpop.xlane.xlu0 %1742 }
 0x32f   : > { %4314 = vpow2.f32 %v1788_v51  ;;  %v1773_v17 = vsub.f32 %v5229_v8, %v1743_v54  ;;  %v1794_v21 = vmul.f32 1.442695, %v1775_v53 }
 0x330   : > { %4316 = vpow2.f32 %v1792_v52 }
 0x331   : > { %v1790_v24 = vmul.f32 1.442695, %v1773_v17 }
 0x332   : > { %v1749_v27 = vpop.xlane.xlu0 %1748 }
 0x333   : > { %4318 = vpow2.f32 %v1790_v24  ;;  %v1776_v29 = vsub.f32 %v5236_v11, %v1749_v27 }
 0x334   : > { %4320 = vpow2.f32 %v1794_v21 }
 0x335   : > { %v1796_v33 = vmul.f32 1.442695, %v1776_v29 }
 0x336   : > { %v1753_v36 = vpop.xlane.xlu0 %1752  ;;  %v1751_v39 = vpop.xlane.xlu1 %1750 }
 0x337   : > { %4322 = vpow2.f32 %v1796_v33  ;;  %v1778_v40 = vsub.f32 %v5232_v9, %v1753_v36  ;;  %v1777_v44 = vsub.f32 %v5243_v14, %v1751_v39 }
 0x339   : > { %v1800_v47 = vmul.f32 1.442695, %v1778_v40  ;;  %v1798_v50 = vmul.f32 1.442695, %v1777_v44 }
 0x33a   : > { %v1755_v55 = vpop.xlane.xlu1 %1754  ;;  %v1757_v56 = vpop.xlane.xlu0 %1756 }
 0x33b   : > { %4324 = vpow2.f32 %v1800_v47  ;;  %v1779_v57 = vsub.f32 %v5239_v12, %v1755_v55  ;;  %v1780_v58 = vsub.f32 %v5251_v18, %v1757_v56 }
 0x33c   : > { %v5321_v59 = vpop.eup %4314  ;;  %4326 = vpow2.f32 %v1798_v50 }
 0x33d   : > { %v1802_v60 = vmul.f32 1.442695, %v1779_v57  ;;  %v1804_v61 = vmul.f32 1.442695, %v1780_v58  ;;  %1820 = vadd.xlane.f32.xlu0 %v5321_v59  ;;  %v5324_v1 = vpop.eup %4316 }
 0x33e   : > { %v1761_v62 = vpop.xlane.xlu0 %1760  ;;  %v1759_v63 = vpop.xlane.xlu1 %1758 }
 0x33f   : > { %4328 = vpow2.f32 %v1802_v60  ;;  %v1782_v3 = vsub.f32 %v5247_v15, %v1761_v62  ;;  %v1781_v5 = vsub.f32 %v5259_v22, %v1759_v63 }
 0x340   : > { %v5328_v6 = vpop.eup %4318  ;;  %4330 = vpow2.f32 %v1804_v61 }
 0x341   : > { %v1808_v8 = vmul.f32 1.442695, %v1782_v3  ;;  %v1806_v9 = vmul.f32 1.442695, %v1781_v5  ;;  %1824 = vadd.xlane.f32.xlu0 %v5324_v1  ;;  %1822 = vadd.xlane.f32.xlu1 %v5328_v6  ;;  %v5332_v14 = vpop.eup %4320 }
 0x342   : > { %v1763_v11 = vpop.xlane.xlu1 %1762  ;;  %v1765_v12 = vpop.xlane.xlu0 %1764 }
 0x343   : > { %4332 = vpow2.f32 %v1808_v8  ;;  %v1783_v18 = vsub.f32 %v5255_v19, %v1763_v11  ;;  %v1784_v15 = vsub.f32 %v5267_v26, %v1765_v12 }
 0x344   : > { %v5336_v43 = vpop.eup %4322  ;;  %4334 = vpow2.f32 %v1806_v9 }
 0x345   : > { %v1810_v22 = vmul.f32 1.442695, %v1783_v18  ;;  %v1812_v45 = vmul.f32 1.442695, %v1784_v15  ;;  %1828 = vadd.xlane.f32.xlu0 %v5336_v43  ;;  %1826 = vadd.xlane.f32.xlu1 %v5332_v14 }
 0x346   : > { %v1769_v46 = vpop.xlane.xlu0 %1768  ;;  %v1767_v48 = vpop.xlane.xlu1 %1766 }
 0x347   : > { %4336 = vpow2.f32 %v1810_v22  ;;  %v1786_v49 = vsub.f32 %v5263_v23, %v1769_v46  ;;  %v1785_v51 = vsub.f32 %v5275_v31, %v1767_v48 }
 0x348   : > { %v5342_v52 = vpop.eup %4324  ;;  %4338 = vpow2.f32 %v1812_v45 }
 0x349   : > { %v5344_v19 = vpop.eup %4326  ;;  %v1816_v26 = vmul.f32 1.442695, %v1786_v49  ;;  %v1814_v53 = vmul.f32 1.442695, %v1785_v51  ;;  %1832 = vadd.xlane.f32.xlu0 %v5342_v52 }
 0x34a   : > { %1830 = vadd.xlane.f32.xlu1 %v5344_v19  ;;  %v2295_v54 = vpop.xlane.xlu0 %2294  ;;  %v1771_v17 = vpop.xlane.xlu1 %1770 }
 0x34b   : > { %4340 = vpow2.f32 %v1816_v26  ;;  %v2326_v24 = vsub.f32 %v5227_v7, %v2295_v54  ;;  %v1787_v23 = vsub.f32 %v5271_v28, %v1771_v17 }
 0x34c   : > { %v5350_v21 = vpop.eup %4328  ;;  %4342 = vpow2.f32 %v1814_v53 }
 0x34d   : > { %v5352_v31 = vpop.eup %4330  ;;  %v2342_v27 = vmul.f32 1.442695, %v2326_v24  ;;  %v1818_v29 = vmul.f32 1.442695, %v1787_v23 }
 0x34e   : > { %1836 = vadd.xlane.f32.xlu0 %v5352_v31  ;;  %1834 = vadd.xlane.f32.xlu1 %v5350_v21  ;;  %v2299_v33 = vpop.xlane.xlu0 %2298  ;;  %v2297_v36 = vpop.xlane.xlu1 %2296 }
 0x34f   : > { %4344 = vpow2.f32 %v2342_v27  ;;  %v2328_v39 = vsub.f32 %v5219_v4, %v2299_v33  ;;  %v2327_v7 = vsub.f32 %v5241_v13, %v2297_v36 }
 0x350   : > { %v5358_v40 = vpop.eup %4332  ;;  %4346 = vpow2.f32 %v1818_v29 }
 0x351   : > { %v5360_v28 = vpop.eup %4334  ;;  %v2346_v44 = vmul.f32 1.442695, %v2328_v39  ;;  %v2344_v47 = vmul.f32 1.442695, %v2327_v7 }
 0x352   : > { %1840 = vadd.xlane.f32.xlu0 %v5358_v40  ;;  %1838 = vadd.xlane.f32.xlu1 %v5360_v28  ;;  %v2303_v50 = vpop.xlane.xlu0 %2302  ;;  %v2301_v55 = vpop.xlane.xlu1 %2300 }
 0x353   : > { %4348 = vpow2.f32 %v2346_v44  ;;  %v2330_v56 = vsub.f32 %v5257_v20, %v2303_v50  ;;  %v2329_v4 = vsub.f32 %v5234_v10, %v2301_v55 }
 0x354   : > { %v5366_v57 = vpop.eup %4336  ;;  %4350 = vpow2.f32 %v2344_v47 }
 0x355   : > { %v5368_v13 = vpop.eup %4338  ;;  %v2350_v58 = vmul.f32 1.442695, %v2330_v56  ;;  %v2348_v60 = vmul.f32 1.442695, %v2329_v4 }
 0x356   : > { %1844 = vadd.xlane.f32.xlu0 %v5368_v13  ;;  %1842 = vadd.xlane.f32.xlu1 %v5366_v57  ;;  %v2307_v61 = vpop.xlane.xlu0 %2306  ;;  %v2305_v62 = vpop.xlane.xlu1 %2304 }
 0x357   : > { %4352 = vpow2.f32 %v2350_v58  ;;  %v2332_v63 = vsub.f32 %v5249_v16, %v2307_v61  ;;  %v2331_v20 = vsub.f32 %v5273_v30, %v2305_v62 }
 0x358   : > { %v5374_v3 = vpop.eup %4340  ;;  %4354 = vpow2.f32 %v2348_v60 }
 0x359   : > { %v5376_v10 = vpop.eup %4342  ;;  %v2354_v5 = vmul.f32 1.442695, %v2332_v63  ;;  %v2352_v8 = vmul.f32 1.442695, %v2331_v20 }
 0x35a   : > { %1848 = vadd.xlane.f32.xlu0 %v5374_v3  ;;  %1846 = vadd.xlane.f32.xlu1 %v5376_v10  ;;  %v2311_v9 = vpop.xlane.xlu0 %2310  ;;  %v2309_v11 = vpop.xlane.xlu1 %2308 }
 0x35b   : > { %4356 = vpow2.f32 %v2354_v5  ;;  %v2334_v12 = vsub.f32 %v5283_v34, %v2311_v9  ;;  %v2333_v16 = vsub.f32 %v5265_v25, %v2309_v11 }
 0x35c   : > { %v5382_v18 = vpop.eup %4344  ;;  %4358 = vpow2.f32 %v2352_v8 }
 0x35d   : > { %v5384_v30 = vpop.eup %4346  ;;  %v2358_v15 = vmul.f32 1.442695, %v2334_v12  ;;  %v2356_v22 = vmul.f32 1.442695, %v2333_v16 }
 0x35e   : > { %2374 = vadd.xlane.f32.xlu0 %v5382_v18  ;;  %1850 = vadd.xlane.f32.xlu1 %v5384_v30  ;;  %v2315_v45 = vpop.xlane.xlu0 %2314  ;;  %v2313_v46 = vpop.xlane.xlu1 %2312 }
 0x35f   : > { %4360 = vpow2.f32 %v2358_v15  ;;  %v2336_v48 = vsub.f32 %v5279_v32, %v2315_v45  ;;  %v2335_v34 = vsub.f32 %v5291_v37, %v2313_v46 }
 0x360   : > { %v5390_v49 = vpop.eup %4348  ;;  %4362 = vpow2.f32 %v2356_v22 }
 0x361   : > { %v5392_v25 = vpop.eup %4350  ;;  %v2362_v51 = vmul.f32 1.442695, %v2336_v48  ;;  %v2360_v26 = vmul.f32 1.442695, %v2335_v34 }
 0x362   : > { %2378 = vadd.xlane.f32.xlu0 %v5390_v49  ;;  %2376 = vadd.xlane.f32.xlu1 %v5392_v25  ;;  %v2319_v53 = vpop.xlane.xlu0 %2318  ;;  %v2317_v54 = vpop.xlane.xlu1 %2316 }
 0x363   : > { %4364 = vpow2.f32 %v2362_v51  ;;  %v2338_v17 = vsub.f32 %v5299_v0, %v2319_v53  ;;  %v2337_v32 = vsub.f32 %v5287_v35, %v2317_v54 }
 0x364   : > { %v5398_v24 = vpop.eup %4352  ;;  %4366 = vpow2.f32 %v2360_v26 }
 0x365   : > { %v5400_v37 = vpop.eup %4354  ;;  %v2366_v23 = vmul.f32 1.442695, %v2338_v17  ;;  %v2364_v27 = vmul.f32 1.442695, %v2337_v32 }
 0x366   : > { %2382 = vadd.xlane.f32.xlu0 %v5398_v24  ;;  %2380 = vadd.xlane.f32.xlu1 %v5400_v37  ;;  %v2323_v29 = vpop.xlane.xlu0 %2322  ;;  %v2321_v33 = vpop.xlane.xlu1 %2320 }
 0x367   : > { %4368 = vpow2.f32 %v2366_v23  ;;  %v2340_v36 = vsub.f32 %v5295_v38, %v2323_v29  ;;  %v2339_v0 = vsub.f32 %v5307_v42, %v2321_v33  ;;  %v4291_v33 = vld [vmem:[#allocation3 + $0x64] ss:$8 sps:$4 sm:$0xff]  }
 0x368   : > { %v5406_v39 = vpop.eup %4356  ;;  %4370 = vpow2.f32 %v2364_v27 }
 0x369   : > { %v5408_v35 = vpop.eup %4358  ;;  %v2370_v7 = vmul.f32 1.442695, %v2340_v36  ;;  %v2368_v44 = vmul.f32 1.442695, %v2339_v0 }
 0x36a   : > { %2386 = vadd.xlane.f32.xlu0 %v5406_v39  ;;  %2384 = vadd.xlane.f32.xlu1 %v5408_v35  ;;  %v2325_v47 = vpop.xlane.xlu1 %2324 }
 0x36b   : > { %4372 = vpow2.f32 %v2370_v7  ;;  %v2341_v50 = vsub.f32 %v5303_v41, %v2325_v47 }
 0x36c   : > { %v5413_v55 = vpop.eup %4360  ;;  %4374 = vpow2.f32 %v2368_v44 }
 0x36d   : > { %v5415_v38 = vpop.eup %4362  ;;  %v2372_v42 = vmul.f32 1.442695, %v2341_v50  ;;  %v4292_v50 = vld [vmem:[#allocation3 + $0x54] ss:$8 sps:$4 sm:$0xff]  }
 0x36e   : > { %2390 = vadd.xlane.f32.xlu0 %v5413_v55  ;;  %2388 = vadd.xlane.f32.xlu1 %v5415_v38 }
 0x36f   : > { %4376 = vpow2.f32 %v2372_v42 }
 0x370   : > { %v5419_v56 = vpop.eup %4364 }
 0x371   : > { %v5421_v4 = vpop.eup %4366 }
 0x372   : > { %2394 = vadd.xlane.f32.xlu0 %v5419_v56  ;;  %2392 = vadd.xlane.f32.xlu1 %v5421_v4 }
 0x374   : > { %v5425_v41 = vpop.eup %4368 }
 0x375   : > { %v5427_v58 = vpop.eup %4370 }
 0x376   : > { %2398 = vadd.xlane.f32.xlu0 %v5425_v41  ;;  %2396 = vadd.xlane.f32.xlu1 %v5427_v58 }
 0x378   : > { %v5431_v60 = vpop.eup %4372 }
 0x379   : > { %v5433_v61 = vpop.eup %4374 }
 0x37a   : > { %2402 = vadd.xlane.f32.xlu0 %v5431_v60  ;;  %2400 = vadd.xlane.f32.xlu1 %v5433_v61 }
 0x37c   : > { %v5437_v62 = vpop.eup %4376 }
 0x37e   : > { %2404 = vadd.xlane.f32.xlu1 %v5437_v62 }
 0x3c6   : > { %v1821_v63 = vpop.xlane.xlu0 %1820 }
 0x3c7   : > { %4378 = vrcp.f32 %v1821_v63 }
 0x3ca   : > { %v1825_v20 = vpop.xlane.xlu0 %1824  ;;  %v1823_v5 = vpop.xlane.xlu1 %1822 }
 0x3cb   : > { %4380 = vrcp.f32 %v1823_v5 }
 0x3cc   : > { %4382 = vrcp.f32 %v1825_v20 }
 0x3ce   : > { %v1829_v8 = vpop.xlane.xlu0 %1828  ;;  %v1827_v9 = vpop.xlane.xlu1 %1826 }
 0x3cf   : > { %4384 = vrcp.f32 %v1827_v9  ;;  %v4293_v9 = vld [vmem:[#allocation3 + $0x44] ss:$8 sps:$4 sm:$0xff]  }
 0x3d0   : > { %4386 = vrcp.f32 %v1829_v8 }
 0x3d2   : > { %v1833_v11 = vpop.xlane.xlu0 %1832 }
 0x3d3   : > { %v1831_v12 = vpop.xlane.xlu1 %1830 }
 0x3d4   : > { %4388 = vrcp.f32 %v1831_v12  ;;  %v4379_v16 = vpop.eup %4378 }
 0x3d5   : > { %4390 = vrcp.f32 %v1833_v11  ;;  %v1868_v46 = vmul.f32 %v4379_v16, %v5321_v59 }
 0x3d7   : > { %v1837_v15 = vpop.xlane.xlu0 %1836  ;;  %v1835_v22 = vpop.xlane.xlu1 %1834 }
 0x3d8   : > { %v4381_v45 = vpop.eup %4380  ;;  %4392 = vrcp.f32 %v1835_v22 }
 0x3d9   : > { %v1869_v48 = vmul.f32 %v4381_v45, %v5328_v6  ;;  %v4383_v34 = vpop.eup %4382  ;;  %4394 = vrcp.f32 %v1837_v15  ;;  %v4294_v45 = vld [vmem:[#allocation3 + $0x34] ss:$8 sps:$4 sm:$0xff]  }
 0x3da   : > { %v1870_v17 = vmul.f32 %v4383_v34, %v5324_v1 }
 0x3db   : > { %v1841_v51 = vpop.xlane.xlu0 %1840  ;;  %v1839_v26 = vpop.xlane.xlu1 %1838  ;;  %v1884_v53 = vpack.c.bf16 %v1869_v48, %v1868_v46 }
 0x3dc   : > { %v4385_v54 = vpop.eup %4384  ;;  %4396 = vrcp.f32 %v1839_v26 }
 0x3dd   : > { %3688 = vst [vmem:[%s5443_s19] sm:$0xff] %v1884_v53   ;;  %3955 = vmatprep.mubr.bf16.mxu1 %v1884_v53  ;;  %v1871_v32 = vmul.f32 %v4385_v54, %v5332_v14  ;;  %v4387_v59 = vpop.eup %4386  ;;  %4398 = vrcp.f32 %v1841_v51  ;;  %v4295_v53 = vld [vmem:[#allocation3 + $0x24] ss:$8 sps:$4 sm:$0xff]  }
 0x3de   : > { %v1872_v36 = vmul.f32 %v4387_v59, %v5336_v43 }
 0x3df   : > { %v1845_v6 = vpop.xlane.xlu0 %1844  ;;  %v1843_v23 = vpop.xlane.xlu1 %1842  ;;  %v1885_v27 = vpack.c.bf16 %v1871_v32, %v1870_v17 }
 0x3e0   : > { %4400 = vrcp.f32 %v1843_v23  ;;  %v4296_v23 = vld [vmem:[#allocation3 + $0x14] ss:$8 sps:$4 sm:$0xff]  }
 0x3e1   : > { %v4389_v29 = vpop.eup %4388  ;;  %3764 = vst [vmem:[%s5443_s19 + $0x8] sm:$0xff] %v1885_v27   ;;  %3956 = vmatmul.mubr.bf16.vlgmr.msra.gmra.mxu1 %v1885_v27  ;;  %4402 = vrcp.f32 %v1845_v6 }
 0x3e2   : > { %v1873_v0 = vmul.f32 %v4389_v29, %v5344_v19  ;;  %4004 = vmatpush3.bf16.msra.mxu1 %v5213_v2  ;;  %v4391_v7 = vpop.eup %4390 }
 0x3e3   : > { %v1849_v1 = vpop.xlane.xlu0 %1848  ;;  %v1847_v14 = vpop.xlane.xlu1 %1846  ;;  %4005 = vmatprep.subr.bf16.mxu1 %v4291_v33  ;;  %v1874_v19 = vmul.f32 %v4391_v7, %v5342_v52 }
 0x3e4   : > { %v1886_v44 = vpack.c.bf16 %v1873_v0, %v1872_v36  ;;  %4404 = vrcp.f32 %v1847_v14 }
 0x3e5   : > { %v4393_v47 = vpop.eup %4392  ;;  %4406 = vrcp.f32 %v1849_v1  ;;  %v4297_v1 = vld [vmem:[#allocation3 + $0x4] ss:$8 sps:$4 sm:$0xff]  }
 0x3e6   : > { %3765 = vst [vmem:[%s5443_s19 + $0x10] sm:$0xff] %v1886_v44   ;;  %3959 = vmatprep.mubr.bf16.mxu1 %v1886_v44  ;;  %4006 = vmatpush3.bf16.msra.mxu1 %v4291_v33  ;;  %v1875_v63 = vmul.f32 %v4393_v47, %v5350_v21  ;;  %v4395_v2 = vpop.eup %4394 }
 0x3e7   : > { %v2375_v42 = vpop.xlane.xlu0 %2374  ;;  %v1851_v43 = vpop.xlane.xlu1 %1850  ;;  %4007 = vmatprep.subr.bf16.mxu1 %v4292_v50  ;;  %v1876_v12 = vmul.f32 %v4395_v2, %v5352_v31 }
 0x3e8   : > { %4408 = vrcp.f32 %v1851_v43  ;;  %v1887_v20 = vpack.c.bf16 %v1875_v63, %v1874_v19 }
 0x3e9   : > { %v4397_v5 = vpop.eup %4396  ;;  %4410 = vrcp.f32 %v2375_v42 }
 0x3ea   : > { %3766 = vst [vmem:[%s5443_s19 + $0x18] sm:$0xff] %v1887_v20   ;;  %3960 = vmatmul.mubr.bf16.gmra.mxu1 %v1887_v20  ;;  %v1877_v16 = vmul.f32 %v4397_v5, %v5360_v28  ;;  %v4399_v15 = vpop.eup %4398 }
 0x3eb   : > { %v2379_v8 = vpop.xlane.xlu0 %2378  ;;  %v2377_v11 = vpop.xlane.xlu1 %2376  ;;  %4008 = vmatpush3.bf16.msra.mxu1 %v4292_v50  ;;  %v1878_v48 = vmul.f32 %v4399_v15, %v5358_v40 }
 0x3ec   : > { %4009 = vmatprep.subr.bf16.mxu1 %v4293_v9  ;;  %4412 = vrcp.f32 %v2377_v11  ;;  %v1888_v52 = vpack.c.bf16 %v1877_v16, %v1876_v12 }
 0x3ed   : > { %v4401_v21 = vpop.eup %4400  ;;  %4414 = vrcp.f32 %v2379_v8 }
 0x3ee   : > { %3767 = vst [vmem:[%s5443_s19 + $0x20] sm:$0xff] %v1888_v52   ;;  %3963 = vmatprep.mubr.bf16.mxu1 %v1888_v52  ;;  %v1879_v34 = vmul.f32 %v4401_v21, %v5366_v57  ;;  %v4403_v31 = vpop.eup %4402 }
 0x3ef   : > { %v2383_v22 = vpop.xlane.xlu0 %2382  ;;  %v2381_v46 = vpop.xlane.xlu1 %2380  ;;  %4010 = vmatpush3.bf16.msra.mxu1 %v4293_v9  ;;  %v1880_v17 = vmul.f32 %v4403_v31, %v5368_v13 }
 0x3f0   : > { %4011 = vmatprep.subr.bf16.mxu1 %v4294_v45  ;;  %4416 = vrcp.f32 %v2381_v46  ;;  %v1889_v28 = vpack.c.bf16 %v1879_v34, %v1878_v48 }
 0x3f1   : > { %v4405_v51 = vpop.eup %4404  ;;  %4418 = vrcp.f32 %v2383_v22 }
 0x3f2   : > { %3768 = vst [vmem:[%s5443_s19 + $0x28] sm:$0xff] %v1889_v28   ;;  %3964 = vmatmul.mubr.bf16.gmra.mxu1 %v1889_v28  ;;  %v1881_v32 = vmul.f32 %v4405_v51, %v5376_v10  ;;  %v4407_v40 = vpop.eup %4406 }
 0x3f3   : > { %v2387_v26 = vpop.xlane.xlu0 %2386  ;;  %v2385_v54 = vpop.xlane.xlu1 %2384  ;;  %4012 = vmatpush3.bf16.msra.mxu1 %v4294_v45  ;;  %v1882_v29 = vmul.f32 %v4407_v40, %v5374_v3  ;;  %v4301_v40 = vld [vmem:[#allocation15 + $0x30] sm:$0xff]  }
 0x3f4   : > { %4013 = vmatprep.subr.bf16.mxu1 %v4295_v53  ;;  %4420 = vrcp.f32 %v2385_v54  ;;  %v1890_v57 = vpack.c.bf16 %v1881_v32, %v1880_v17  ;;  %v4299_v17 = vld [vmem:[#allocation15 + $0x38] sm:$0xff]   ;;  %v4300_v32 = vld [vmem:[#allocation15 + $0x70] sm:$0xff]  }
 0x3f5   : > { %v4409_v59 = vpop.eup %4408  ;;  %4422 = vrcp.f32 %v2387_v26 }
 0x3f6   : > { %3769 = vst [vmem:[%s5443_s19 + $0x30] sm:$0xff] %v1890_v57   ;;  %3967 = vmatprep.mubr.bf16.mxu1 %v1890_v57  ;;  %v1883_v33 = vmul.f32 %v4409_v59, %v5384_v30  ;;  %v4411_v13 = vpop.eup %4410  ;;  %v4305_v57 = vld [vmem:[#allocation15 + $0x20] sm:$0xff]   ;;  %v4307_v59 = vld [vmem:[#allocation15 + $0x18] sm:$0xff]  }
 0x3f7   : > { %v2391_v6 = vpop.xlane.xlu0 %2390  ;;  %v2389_v27 = vpop.xlane.xlu1 %2388  ;;  %4014 = vmatpush3.bf16.msra.mxu1 %v4295_v53  ;;  %v2422_v7 = vmul.f32 %v4411_v13, %v5382_v18  ;;  %v4313_v13 = vld [vmem:[#allocation15] sm:$0xff]  }
 0x3f8   : > { %4015 = vmatprep.subr.bf16.mxu1 %v4296_v23  ;;  %4424 = vrcp.f32 %v2389_v27  ;;  %v1891_v10 = vpack.c.bf16 %v1883_v33, %v1882_v29  ;;  %v4310_v27 = vld [vmem:[#allocation15 + $0x48] sm:$0xff]   ;;  %v4312_v33 = vld [vmem:[#allocation15 + $0x40] sm:$0xff]  }
 0x3f9   : > { %v4413_v36 = vpop.eup %4412  ;;  %4426 = vrcp.f32 %v2391_v6  ;;  %v4308_v6 = vld [vmem:[#allocation15 + $0x50] sm:$0xff]   ;;  %v4311_v29 = vld [vmem:[#allocation15 + $0x8] sm:$0xff]  }
 0x3fa   : > { %3770 = vst [vmem:[%s5443_s19 + $0x38] sm:$0xff] %v1891_v10   ;;  %3968 = vmatmul.mubr.bf16.gmra.mxu1 %v1891_v10  ;;  %v2423_v44 = vmul.f32 %v4413_v36, %v5392_v25  ;;  %v4415_v3 = vpop.eup %4414 }
 0x3fb   : > { %v2395_v0 = vpop.xlane.xlu0 %2394  ;;  %v2393_v14 = vpop.xlane.xlu1 %2392  ;;  %4016 = vmatpush3.bf16.msra.mxu1 %v4296_v23  ;;  %v2424_v43 = vmul.f32 %v4415_v3, %v5390_v49  ;;  %v4309_v23 = vld [vmem:[#allocation15 + $0x10] sm:$0xff]  }
 0x3fc   : > { %4017 = vmatprep.subr.bf16.mxu1 %v4297_v1  ;;  %4428 = vrcp.f32 %v2393_v14  ;;  %v2438_v30 = vpack.c.bf16 %v2423_v44, %v2422_v7 }
 0x3fd   : > { %v4417_v47 = vpop.eup %4416  ;;  %4430 = vrcp.f32 %v2395_v0 }
 0x3fe   : > { %3771 = vst [vmem:[%s5443_s19 + $0x40] sm:$0xff] %v2438_v30   ;;  %4019 = vmatprep.mubr.bf16.mxu1 %v2438_v30  ;;  %v2425_v19 = vmul.f32 %v4417_v47, %v5400_v37  ;;  %v4419_v63 = vpop.eup %4418 }
 0x3ff   : > { %v2399_v50 = vpop.xlane.xlu0 %2398  ;;  %v2397_v42 = vpop.xlane.xlu1 %2396  ;;  %4018 = vmatpush3.bf16.msra.mxu1 %v4297_v1  ;;  %v2426_v5 = vmul.f32 %v4419_v63, %v5398_v24 }
 0x400   : > { %4432 = vrcp.f32 %v2397_v42  ;;  %v2439_v18 = vpack.c.bf16 %v2425_v19, %v2424_v43 }
 0x401   : > { %v4421_v25 = vpop.eup %4420  ;;  %4434 = vrcp.f32 %v2399_v50 }
 0x402   : > { %3772 = vst [vmem:[%s5443_s19 + $0x48] sm:$0xff] %v2439_v18   ;;  %4020 = vmatmul.mubr.bf16.vlgmr.msra.gmra.mxu1 %v2439_v18  ;;  %v2427_v8 = vmul.f32 %v4421_v25, %v5408_v35  ;;  %v4423_v9 = vpop.eup %4422 }
 0x403   : > { %v2403_v2 = vpop.xlane.xlu0 %2402  ;;  %v2401_v20 = vpop.xlane.xlu1 %2400  ;;  %v2428_v12 = vmul.f32 %v4423_v9, %v5406_v39 }
 0x404   : > { %4436 = vrcp.f32 %v2401_v20  ;;  %v2440_v49 = vpack.c.bf16 %v2427_v8, %v2426_v5 }
 0x405   : > { %v4425_v37 = vpop.eup %4424  ;;  %4438 = vrcp.f32 %v2403_v2 }
 0x406   : > { %3773 = vst [vmem:[%s5443_s19 + $0x50] sm:$0xff] %v2440_v49   ;;  %4023 = vmatprep.mubr.bf16.mxu1 %v2440_v49  ;;  %v2429_v16 = vmul.f32 %v4425_v37, %v5415_v38  ;;  %v4427_v15 = vpop.eup %4426 }
 0x407   : > { %v2405_v11 = vpop.xlane.xlu1 %2404  ;;  %v2430_v35 = vmul.f32 %v4427_v15, %v5413_v55 }
 0x408   : > { %4440 = vrcp.f32 %v2405_v11  ;;  %v2441_v52 = vpack.c.bf16 %v2429_v16, %v2428_v12 }
 0x409   : > { %v4429_v24 = vpop.eup %4428 }
 0x40a   : > { %3774 = vst [vmem:[%s5443_s19 + $0x58] sm:$0xff] %v2441_v52   ;;  %4024 = vmatmul.mubr.bf16.gmra.mxu1 %v2441_v52  ;;  %v2431_v21 = vmul.f32 %v4429_v24, %v5421_v4  ;;  %v4431_v22 = vpop.eup %4430 }
 0x40b   : > { %v2432_v39 = vmul.f32 %v4431_v22, %v5419_v56 }
 0x40c   : > { %v2442_v45 = vpack.c.bf16 %v2431_v21, %v2430_v35 }
 0x40d   : > { %v4433_v46 = vpop.eup %4432 }
 0x40e   : > { %3775 = vst [vmem:[%s5443_s19 + $0x60] sm:$0xff] %v2442_v45   ;;  %4027 = vmatprep.mubr.bf16.mxu1 %v2442_v45  ;;  %v2433_v38 = vmul.f32 %v4433_v46, %v5427_v58  ;;  %v4435_v48 = vpop.eup %4434  ;;  %v4298_v58 = vld [vmem:[#allocation15 + $0x78] sm:$0xff]  }
 0x40f   : > { %v2434_v55 = vmul.f32 %v4435_v48, %v5425_v41  ;;  %3843 = vmatprep.subr.bf16.mxu0 %v4298_v58  ;;  %v4302_v41 = vld [vmem:[#allocation15 + $0x68] sm:$0xff]  }
 0x410   : > { %v2443_v34 = vpack.c.bf16 %v2433_v38, %v2432_v39  ;;  %3844 = vmatpush3.bf16.msra.mxu0 %v4299_v17 }
 0x411   : > { %v4437_v31 = vpop.eup %4436  ;;  %3845 = vmatprep.subr.bf16.mxu0 %v4300_v32 }
 0x412   : > { %v4439_v28 = vpop.eup %4438  ;;  %3776 = vst [vmem:[%s5443_s19 + $0x68] sm:$0xff] %v2443_v34   ;;  %4028 = vmatmul.mubr.bf16.gmra.mxu1 %v2443_v34  ;;  %v2435_v4 = vmul.f32 %v4437_v31, %v5433_v61  ;;  %v4303_v61 = vld [vmem:[#allocation15 + $0x28] sm:$0xff]  }
 0x413   : > { %v2436_v53 = vmul.f32 %v4439_v28, %v5431_v60  ;;  %v4304_v60 = vld [vmem:[#allocation15 + $0x60] sm:$0xff]  }
 0x414   : > { %v2444_v26 = vpack.c.bf16 %v2435_v4, %v2434_v55  ;;  %3846 = vmatpush3.bf16.msra.mxu0 %v4301_v40 }
 0x415   : > { %v4441_v51 = vpop.eup %4440  ;;  %3847 = vmatprep.subr.bf16.mxu0 %v4302_v41  ;;  %v4474_v41 = vld [vmem:[%s5079_s13] sm:$0xff] }
 0x416   : > { %v2437_v54 = vmul.f32 %v4441_v51, %v5437_v62  ;;  %3777 = vst [vmem:[%s5443_s19 + $0x70] sm:$0xff] %v2444_v26   ;;  %4031 = vmatprep.mubr.bf16.mxu1 %v2444_v26  ;;  %v4306_v62 = vld [vmem:[#allocation15 + $0x58] sm:$0xff]  }
 0x418   : > { %v2445_v56 = vpack.c.bf16 %v2437_v54, %v2436_v53  ;;  %3848 = vmatpush3.bf16.msra.mxu0 %v4303_v61 }
 0x419   : > { %3849 = vmatprep.subr.bf16.mxu0 %v4304_v60 }
 0x41a   : > { %3778 = vst [vmem:[%s5443_s19 + $0x78] sm:$0xff] %v2445_v56   ;;  %4032 = vmatmul.mubr.bf16.gmra.mxu1 %v2445_v56 }
 0x41c   : > { %3850 = vmatpush3.bf16.msra.mxu0 %v4305_v57 }
 0x41d   : > { %3851 = vmatprep.subr.bf16.mxu0 %v4306_v62 }
 0x420   : > { %3852 = vmatpush3.bf16.msra.mxu0 %v4307_v59  ;;  %v4475_v59 = vld [vmem:[%s5079_s13 + $0x8] sm:$0xff] }
 0x421   : > { %3853 = vmatprep.subr.bf16.mxu0 %v4308_v6 }
 0x424   : > { %3854 = vmatpush3.bf16.msra.mxu0 %v4309_v23 }
 0x425   : > { %3855 = vmatprep.subr.bf16.mxu0 %v4310_v27 }
 0x428   : > { %3856 = vmatpush3.bf16.msra.mxu0 %v4311_v29 }
 0x429   : > { %3857 = vmatprep.subr.bf16.mxu0 %v4312_v33  ;;  %v4476_v33 = vld [vmem:[%s5079_s13 + $0x10] sm:$0xff] }
 0x42c   : > { %3858 = vmatpush3.bf16.msra.mxu0 %v4313_v13 }
 0x4a1   : > { %v3957_v10 = vpop.f32.mrf.mxu1 }
 0x4a3   : > { %v2046_v36 = vpop.f32.mrf.mxu1 }
 0x4a5   : > { %v3958_v0 = vpop.f32.mrf.mxu1 }
 0x4a6   : > { %v2665_v52 = vpack.c.bf16 %v3958_v0, %v3957_v10 }
 0x4a7   : > { %v2049_v1 = vpop.f32.mrf.mxu1 }
 0x4a8   : > { %v2664_v49 = vpack.c.bf16 %v2049_v1, %v2046_v36  ;;  %v4477_v1 = vld [vmem:[%s5079_s13 + $0x18] sm:$0xff] }
 0x4aa   : > { %v3961_v14 = vpop.f32.mrf.mxu1 }
 0x4ac   : > { %v2062_v7 = vpop.f32.mrf.mxu1 }
 0x4ae   : > { %v3962_v44 = vpop.f32.mrf.mxu1 }
 0x4af   : > { %v2667_v38 = vpack.c.bf16 %v3962_v44, %v3961_v14 }
 0x4b0   : > { %v2065_v3 = vpop.f32.mrf.mxu1 }
 0x4b1   : > { %v2666_v22 = vpack.c.bf16 %v2065_v3, %v2062_v7 }
 0x4b2   : > { %v3965_v30 = vpop.f32.mrf.mxu1 }
 0x4b4   : > { %v2078_v47 = vpop.f32.mrf.mxu1 }
 0x4b6   : > { %v3966_v50 = vpop.f32.mrf.mxu1 }
 0x4b7   : > { %v2669_v26 = vpack.c.bf16 %v3966_v50, %v3965_v30  ;;  %v4478_v30 = vld [vmem:[%s5079_s13 + $0x20] sm:$0xff] }
 0x4b8   : > { %v2081_v42 = vpop.f32.mrf.mxu1 }
 0x4b9   : > { %v2668_v28 = vpack.c.bf16 %v2081_v42, %v2078_v47 }
 0x4ba   : > { %v3969_v43 = vpop.f32.mrf.mxu1 }
 0x4bc   : > { %v2094_v19 = vpop.f32.mrf.mxu1 }
 0x4be   : > { %v3970_v63 = vpop.f32.mrf.mxu1 }
 0x4bf   : > { %v2671_v18 = vpack.c.bf16 %v3970_v63, %v3969_v43 }
 0x4c0   : > { %v2097_v25 = vpop.f32.mrf.mxu1 }
 0x4c1   : > { %v2670_v54 = vpack.c.bf16 %v2097_v25, %v2094_v19  ;;  %v4479_v19 = vld [vmem:[%s5079_s13 + $0x28] sm:$0xff] }
 0x4c2   : > { %v4021_v2 = vpop.f32.mrf.mxu1 }
 0x4c4   : > { %v2601_v20 = vpop.f32.mrf.mxu1 }
 0x4c6   : > { %v4022_v5 = vpop.f32.mrf.mxu1 }
 0x4c7   : > { %v2673_v11 = vpack.c.bf16 %v4022_v5, %v4021_v2 }
 0x4c8   : > { %v2604_v8 = vpop.f32.mrf.mxu1 }
 0x4c9   : > { %v2672_v9 = vpack.c.bf16 %v2604_v8, %v2601_v20  ;;  %v4480_v20 = vld [vmem:[%s5079_s13 + $0x30] sm:$0xff] }
 0x4ca   : > { %v4025_v37 = vpop.f32.mrf.mxu1 }
 0x4cb   : > { %2840 = vmatprep.mubr.bf16.mxu0 %v2672_v9 }
 0x4cc   : > { %v2617_v12 = vpop.f32.mrf.mxu1  ;;  %2841 = vmatmul.mubr.bf16.vlgmr.msra.gmra.mxu0 %v2664_v49 }
 0x4cd   : > { %2848 = vmatprep.mubr.bf16.mxu0 %v2673_v11 }
 0x4ce   : > { %v4026_v16 = vpop.f32.mrf.mxu1 }
 0x4cf   : > { %v2675_v45 = vpack.c.bf16 %v4026_v16, %v4025_v37  ;;  %v4481_v37 = vld [vmem:[%s5079_s13 + $0x38] sm:$0xff] }
 0x4d0   : > { %v2620_v15 = vpop.f32.mrf.mxu1 }
 0x4d1   : > { %v2674_v24 = vpack.c.bf16 %v2620_v15, %v2617_v12 }
 0x4d2   : > { %v4029_v35 = vpop.f32.mrf.mxu1 }
 0x4d4   : > { %2849 = vmatmul.mubr.bf16.gmra.mxu0 %v2665_v52  ;;  %v2633_v21 = vpop.f32.mrf.mxu1  ;;  %v4482_v52 = vld [vmem:[%s5079_s13 + $0x40] sm:$0xff] }
 0x4d5   : > { %2856 = vmatprep.mubr.bf16.mxu0 %v2674_v24 }
 0x4d6   : > { %v4030_v46 = vpop.f32.mrf.mxu1 }
 0x4d7   : > { %v2677_v55 = vpack.c.bf16 %v4030_v46, %v4029_v35 }
 0x4d8   : > { %v2636_v39 = vpop.f32.mrf.mxu1 }
 0x4d9   : > { %v2676_v48 = vpack.c.bf16 %v2636_v39, %v2633_v21 }
 0x4da   : > { %v4033_v34 = vpop.f32.mrf.mxu1 }
 0x4dc   : > { %2857 = vmatmul.mubr.bf16.gmra.mxu0 %v2666_v22  ;;  %v2649_v31 = vpop.f32.mrf.mxu1 }
 0x4dd   : > { %2864 = vmatprep.mubr.bf16.mxu0 %v2675_v45  ;;  %v4483_v45 = vld [vmem:[%s5079_s13 + $0x48] sm:$0xff] }
 0x4de   : > { %v4034_v4 = vpop.f32.mrf.mxu1 }
 0x4df   : > { %v2679_v56 = vpack.c.bf16 %v4034_v4, %v4033_v34  ;;  %v4484_v34 = vld [vmem:[%s5079_s13 + $0x50] sm:$0xff] }
 0x4e0   : > { %v2652_v51 = vpop.f32.mrf.mxu1 }
 0x4e1   : > { %v2678_v53 = vpack.c.bf16 %v2652_v51, %v2649_v31  ;;  %v4485_v51 = vld [vmem:[%s5079_s13 + $0x58] sm:$0xff] }
 0x4e4   : > { %2865 = vmatmul.mubr.bf16.gmra.mxu0 %v2667_v38 }
 0x4e5   : > { %2872 = vmatprep.mubr.bf16.mxu0 %v2676_v48 }
 0x4ec   : > { %2873 = vmatmul.mubr.bf16.gmra.mxu0 %v2668_v28 }
 0x4ed   : > { %2880 = vmatprep.mubr.bf16.mxu0 %v2677_v55 }
 0x4f4   : > { %2881 = vmatmul.mubr.bf16.gmra.mxu0 %v2669_v26 }
 0x4f5   : > { %2888 = vmatprep.mubr.bf16.mxu0 %v2678_v53 }
 0x4fc   : > { %2889 = vmatmul.mubr.bf16.gmra.mxu0 %v2670_v54 }
 0x4fd   : > { %2896 = vmatprep.mubr.bf16.mxu0 %v2679_v56 }
 0x504   : > { %2897 = vmatmul.mubr.bf16.gmra.mxu0 %v2671_v18 }
 0x58c   : > { %v3859_v58 = vpop.f32.mrf.mxu0 }
 0x58e   : > { %v3860_v17 = vpop.f32.mrf.mxu0 }
 0x58f   : > { %v3861_v32 = vadd.f32 %v3860_v17, %v3859_v58  ;;  %v4486_v58 = vld [vmem:[%s5079_s13 + $0x60] sm:$0xff] }
 0x590   : > { %v3862_v40 = vpop.f32.mrf.mxu0 }
 0x591   : > { %v5493_v61 = vadd.f32 %v4474_v41, %v3861_v32 }
 0x592   : > { %v3863_v60 = vpop.f32.mrf.mxu0 }
 0x593   : > { %v3864_v57 = vadd.f32 %v3863_v60, %v3862_v40  ;;  %2905 = vadd.xlane.f32.xlu0 %v5493_v61  ;;  %v4487_v60 = vld [vmem:[%s5079_s13 + $0x68] sm:$0xff] }
 0x594   : > { %v3865_v62 = vpop.f32.mrf.mxu0 }
 0x595   : > { %v5497_v6 = vadd.f32 %v4475_v59, %v3864_v57 }
 0x596   : > { %v3866_v23 = vpop.f32.mrf.mxu0 }
 0x597   : > { %v3867_v27 = vadd.f32 %v3866_v23, %v3865_v62  ;;  %2907 = vadd.xlane.f32.xlu1 %v5497_v6 }
 0x598   : > { %v3868_v29 = vpop.f32.mrf.mxu0 }
 0x599   : > { %v5501_v13 = vadd.f32 %v4476_v33, %v3867_v27  ;;  %v4488_v27 = vld [vmem:[%s5079_s13 + $0x70] sm:$0xff] }
 0x59a   : > { %v3869_v10 = vpop.f32.mrf.mxu0 }
 0x59b   : > { %v3870_v36 = vadd.f32 %v3869_v10, %v3868_v29  ;;  %2909 = vadd.xlane.f32.xlu0 %v5501_v13 }
 0x59c   : > { %v3871_v0 = vpop.f32.mrf.mxu0 }
 0x59d   : > { %v5505_v14 = vadd.f32 %v4477_v1, %v3870_v36  ;;  %v4489_v36 = vld [vmem:[%s5079_s13 + $0x78] sm:$0xff] }
 0x59e   : > { %v3872_v7 = vpop.f32.mrf.mxu0 }
 0x59f   : > { %v3873_v44 = vadd.f32 %v3872_v7, %v3871_v0  ;;  %2911 = vadd.xlane.f32.xlu1 %v5505_v14 }
 0x5a0   : > { %v3874_v3 = vpop.f32.mrf.mxu0 }
 0x5a1   : > { %v5509_v47 = vadd.f32 %v4478_v30, %v3873_v44 }
 0x5a2   : > { %v3875_v50 = vpop.f32.mrf.mxu0 }
 0x5a3   : > { %v3876_v42 = vadd.f32 %v3875_v50, %v3874_v3  ;;  %2913 = vadd.xlane.f32.xlu0 %v5509_v47 }
 0x5a4   : > { %v3877_v43 = vpop.f32.mrf.mxu0 }
 0x5a5   : > { %v5513_v63 = vadd.f32 %v4479_v19, %v3876_v42 }
 0x5a6   : > { %v3878_v18 = vpop.f32.mrf.mxu0 }
 0x5a7   : > { %v3879_v25 = vadd.f32 %v3878_v18, %v3877_v43  ;;  %2915 = vadd.xlane.f32.xlu1 %v5513_v63 }
 0x5a8   : > { %v3880_v2 = vpop.f32.mrf.mxu0 }
 0x5a9   : > { %v5517_v5 = vadd.f32 %v4480_v20, %v3879_v25 }
 0x5aa   : > { %v3881_v8 = vpop.f32.mrf.mxu0 }
 0x5ab   : > { %v3882_v9 = vadd.f32 %v3881_v8, %v3880_v2  ;;  %2917 = vadd.xlane.f32.xlu0 %v5517_v5 }
 0x5ac   : > { %v3883_v49 = vpop.f32.mrf.mxu0 }
 0x5ad   : > { %v5521_v11 = vadd.f32 %v4481_v37, %v3882_v9 }
 0x5ae   : > { %v3884_v12 = vpop.f32.mrf.mxu0 }
 0x5af   : > { %v3885_v16 = vadd.f32 %v3884_v12, %v3883_v49  ;;  %2919 = vadd.xlane.f32.xlu1 %v5521_v11 }
 0x5b0   : > { %v3886_v15 = vpop.f32.mrf.mxu0 }
 0x5b1   : > { %v5525_v24 = vadd.f32 %v4482_v52, %v3885_v16 }
 0x5b2   : > { %v3887_v35 = vpop.f32.mrf.mxu0 }
 0x5b3   : > { %v3888_v21 = vadd.f32 %v3887_v35, %v3886_v15  ;;  %2921 = vadd.xlane.f32.xlu0 %v5525_v24 }
 0x5b4   : > { %v3889_v22 = vpop.f32.mrf.mxu0 }
 0x5b5   : > { %v5529_v46 = vadd.f32 %v4483_v45, %v3888_v21 }
 0x5b6   : > { %v3890_v39 = vpop.f32.mrf.mxu0 }
 0x5b7   : > { %v3891_v38 = vadd.f32 %v3890_v39, %v3889_v22  ;;  %2923 = vadd.xlane.f32.xlu1 %v5529_v46 }
 0x5b8   : > { %v3892_v48 = vpop.f32.mrf.mxu0 }
 0x5b9   : > { %v5533_v31 = vadd.f32 %v4484_v34, %v3891_v38 }
 0x5ba   : > { %v3893_v28 = vpop.f32.mrf.mxu0 }
 0x5bb   : > { %v3894_v55 = vadd.f32 %v3893_v28, %v3892_v48  ;;  %2925 = vadd.xlane.f32.xlu0 %v5533_v31 }
 0x5bc   : > { %v3895_v4 = vpop.f32.mrf.mxu0 }
 0x5bd   : > { %v5537_v26 = vadd.f32 %v4485_v51, %v3894_v55 }
 0x5be   : > { %v3896_v53 = vpop.f32.mrf.mxu0 }
 0x5bf   : > { %v3897_v54 = vadd.f32 %v3896_v53, %v3895_v4  ;;  %2927 = vadd.xlane.f32.xlu1 %v5537_v26 }
 0x5c0   : > { %v3898_v56 = vpop.f32.mrf.mxu0 }
 0x5c1   : > { %v5541_v17 = vadd.f32 %v4486_v58, %v3897_v54 }
 0x5c2   : > { %v3899_v32 = vpop.f32.mrf.mxu0 }
 0x5c3   : > { %v3900_v40 = vadd.f32 %v3899_v32, %v3898_v56  ;;  %2929 = vadd.xlane.f32.xlu0 %v5541_v17 }
 0x5c4   : > { %v3901_v41 = vpop.f32.mrf.mxu0 }
 0x5c5   : > { %v5545_v57 = vadd.f32 %v4487_v60, %v3900_v40 }
 0x5c6   : > { %v3902_v62 = vpop.f32.mrf.mxu0 }
 0x5c7   : > { %v3903_v59 = vadd.f32 %v3902_v62, %v3901_v41  ;;  %2931 = vadd.xlane.f32.xlu1 %v5545_v57 }
 0x5c8   : > { %v3904_v23 = vpop.f32.mrf.mxu0 }
 0x5c9   : > { %v5549_v29 = vadd.f32 %v4488_v27, %v3903_v59 }
 0x5ca   : > { %v3905_v33 = vpop.f32.mrf.mxu0 }
 0x5cb   : > { %v3906_v10 = vadd.f32 %v3905_v33, %v3904_v23  ;;  %2933 = vadd.xlane.f32.xlu0 %v5549_v29 }
 0x5cd   : > { %v5553_v0 = vadd.f32 %v4489_v36, %v3906_v10 }
 0x5cf   : > { %2935 = vadd.xlane.f32.xlu1 %v5553_v0 }
 0x61c   : > { %v2906_v1 = vpop.xlane.xlu0 %2905 }
 0x61d   : > { %v2938_v7 = vmul.f32 0.0078125, %v2906_v1 }
 0x61f   : > { %v5557_v44 = vsub.f32 %v5493_v61, %v2938_v7 }
 0x620   : > { %v2908_v3 = vpop.xlane.xlu1 %2907 }
 0x621   : > { %v2939_v30 = vmul.f32 0.0078125, %v2908_v3  ;;  %v2970_v50 = vmul.f32 %v5557_v44, %v5557_v44 }
 0x623   : > { %v5562_v42 = vsub.f32 %v5497_v6, %v2939_v30  ;;  %2986 = vadd.xlane.f32.xlu0 %v2970_v50 }
 0x624   : > { %v2910_v43 = vpop.xlane.xlu0 %2909 }
 0x625   : > { %v2940_v19 = vmul.f32 0.0078125, %v2910_v43  ;;  %v2971_v18 = vmul.f32 %v5562_v42, %v5562_v42 }
 0x627   : > { %v5567_v25 = vsub.f32 %v5501_v13, %v2940_v19  ;;  %2988 = vadd.xlane.f32.xlu1 %v2971_v18 }
 0x628   : > { %v2912_v61 = vpop.xlane.xlu1 %2911 }
 0x629   : > { %v2941_v2 = vmul.f32 0.0078125, %v2912_v61  ;;  %v2972_v20 = vmul.f32 %v5567_v25, %v5567_v25 }
 0x62b   : > { %v5572_v8 = vsub.f32 %v5505_v14, %v2941_v2  ;;  %2990 = vadd.xlane.f32.xlu0 %v2972_v20 }
 0x62c   : > { %v2914_v6 = vpop.xlane.xlu0 %2913 }
 0x62d   : > { %v2942_v9 = vmul.f32 0.0078125, %v2914_v6  ;;  %v2973_v49 = vmul.f32 %v5572_v8, %v5572_v8 }
 0x62f   : > { %v5577_v37 = vsub.f32 %v5509_v47, %v2942_v9  ;;  %2992 = vadd.xlane.f32.xlu1 %v2973_v49 }
 0x630   : > { %v2916_v13 = vpop.xlane.xlu1 %2915 }
 0x631   : > { %v2943_v12 = vmul.f32 0.0078125, %v2916_v13  ;;  %v2974_v16 = vmul.f32 %v5577_v37, %v5577_v37 }
 0x633   : > { %v5582_v15 = vsub.f32 %v5513_v63, %v2943_v12  ;;  %2994 = vadd.xlane.f32.xlu0 %v2974_v16 }
 0x634   : > { %v2918_v14 = vpop.xlane.xlu0 %2917 }
 0x635   : > { %v2944_v52 = vmul.f32 0.0078125, %v2918_v14  ;;  %v2975_v35 = vmul.f32 %v5582_v15, %v5582_v15 }
 0x637   : > { %v5587_v21 = vsub.f32 %v5517_v5, %v2944_v52  ;;  %2996 = vadd.xlane.f32.xlu1 %v2975_v35 }
 0x638   : > { %v2920_v47 = vpop.xlane.xlu1 %2919 }
 0x639   : > { %v2945_v22 = vmul.f32 0.0078125, %v2920_v47  ;;  %v2976_v45 = vmul.f32 %v5587_v21, %v5587_v21 }
 0x63b   : > { %v5592_v39 = vsub.f32 %v5521_v11, %v2945_v22  ;;  %2998 = vadd.xlane.f32.xlu0 %v2976_v45 }
 0x63c   : > { %v2922_v63 = vpop.xlane.xlu0 %2921 }
 0x63d   : > { %v2946_v38 = vmul.f32 0.0078125, %v2922_v63  ;;  %v2977_v48 = vmul.f32 %v5592_v39, %v5592_v39 }
 0x63f   : > { %v5597_v34 = vsub.f32 %v5525_v24, %v2946_v38  ;;  %3000 = vadd.xlane.f32.xlu1 %v2977_v48 }
 0x640   : > { %v2924_v5 = vpop.xlane.xlu1 %2923 }
 0x641   : > { %v2947_v28 = vmul.f32 0.0078125, %v2924_v5  ;;  %v2978_v55 = vmul.f32 %v5597_v34, %v5597_v34 }
 0x643   : > { %v5602_v4 = vsub.f32 %v5529_v46, %v2947_v28  ;;  %3002 = vadd.xlane.f32.xlu0 %v2978_v55 }
 0x644   : > { %v2926_v11 = vpop.xlane.xlu0 %2925 }
 0x645   : > { %v2948_v51 = vmul.f32 0.0078125, %v2926_v11  ;;  %v2979_v53 = vmul.f32 %v5602_v4, %v5602_v4 }
 0x647   : > { %v5607_v54 = vsub.f32 %v5533_v31, %v2948_v51  ;;  %3004 = vadd.xlane.f32.xlu1 %v2979_v53 }
 0x648   : > { %v2928_v24 = vpop.xlane.xlu1 %2927 }
 0x649   : > { %v2949_v56 = vmul.f32 0.0078125, %v2928_v24  ;;  %v2980_v58 = vmul.f32 %v5607_v54, %v5607_v54 }
 0x64b   : > { %v5612_v32 = vsub.f32 %v5537_v26, %v2949_v56  ;;  %3006 = vadd.xlane.f32.xlu0 %v2980_v58 }
 0x64c   : > { %v2930_v46 = vpop.xlane.xlu0 %2929 }
 0x64d   : > { %v2950_v40 = vmul.f32 0.0078125, %v2930_v46  ;;  %v2981_v41 = vmul.f32 %v5612_v32, %v5612_v32 }
 0x64f   : > { %v5617_v60 = vsub.f32 %v5541_v17, %v2950_v40  ;;  %3008 = vadd.xlane.f32.xlu1 %v2981_v41 }
 0x650   : > { %v2932_v31 = vpop.xlane.xlu1 %2931 }
 0x651   : > { %v2951_v62 = vmul.f32 0.0078125, %v2932_v31  ;;  %v2982_v59 = vmul.f32 %v5617_v60, %v5617_v60 }
 0x653   : > { %v5622_v26 = vsub.f32 %v5545_v57, %v2951_v62  ;;  %3010 = vadd.xlane.f32.xlu0 %v2982_v59 }
 0x654   : > { %v2934_v23 = vpop.xlane.xlu0 %2933 }
 0x655   : > { %v2952_v27 = vmul.f32 0.0078125, %v2934_v23  ;;  %v2983_v17 = vmul.f32 %v5622_v26, %v5622_v26 }
 0x657   : > { %v5627_v33 = vsub.f32 %v5549_v29, %v2952_v27  ;;  %3012 = vadd.xlane.f32.xlu1 %v2983_v17 }
 0x658   : > { %v2936_v10 = vpop.xlane.xlu1 %2935 }
 0x659   : > { %v2953_v36 = vmul.f32 0.0078125, %v2936_v10  ;;  %v2984_v1 = vmul.f32 %v5627_v33, %v5627_v33 }
 0x65b   : > { %v5632_v57 = vsub.f32 %v5553_v0, %v2953_v36  ;;  %3014 = vadd.xlane.f32.xlu0 %v2984_v1 }
 0x65d   : > { %v2985_v7 = vmul.f32 %v5632_v57, %v5632_v57 }
 0x65f   : > { %3016 = vadd.xlane.f32.xlu1 %v2985_v7 }
 0x660   : > { %4691 = shalt.err (!%p4688_p13)
}
 0x661   : > { %s4692_s15 = scalar_lea.hbm %s5642_s26, 2048  ;;  %s4696_s30 = scalar_lea.hbm %s5865_s25, 4096 }
 0x662   : > { %p4693_p11 = scmp.ne.s32.totalorder %s5642_s26, %s4692_s15  ;;  %p4697_p8 = scmp.lt.s32.totalorder %s5642_s26, %s5865_s25 }
 0x663   : > { %p4698_p10 = scmp.lt.s32.totalorder %s4696_s30, %s4692_s15 }
 0x664   : > { %p4694_p0 = pnand %p4693_p11, %p4971_p3 }
 0x665   : > { %p4699_p5 = por %p4698_p10, %p4697_p8 }
 0x666   : > { %p4695_p1 = pneg %p4694_p0 }
 0x668   : > { %p4700_p4 = pnand %p4699_p5, %p4695_p1 }
 0x66a   : > { %4703 = shalt.err (!%p4700_p4)
}
 0x66b   : > { %s4815_s23 = smov 64   ;;  %s4816_s22 = smov 4  }
 0x66c   : > { %4074 = dma.vmem_to_hbm [thread:$0]  (%p4971_p3), %s5645_s8, 2048, %s5642_s26, %s3150_s10, %s4815_s23, %s4815_s23, %s4816_s22  }
 0x66d   : > { %s5866_s19 = sld [smem:[#allocation35_spill]]  ;;  %s5685_s8 = scalar_lea.vmem [#allocation16], %s5075_s3 }
 0x66e   : > { %s5867_s26 = sld [smem:[#allocation36_spill]]  ;;  %s3165_s3 = sshll.u32 %s5685_s8, 4  ;;  %s5753_s3 = int_to_ptr.vmem [resolvable:$true] %s3165_s3 }
 0x66f   : > { %s5868_s28 = sld [smem:[#allocation37_spill]]  ;;  %s3145_s5 = scalar_lea.sflag [#allocation6], %s5072_s2 }
 0x670   : > { %s4704_s15 = scalar_lea.vmem %s5753_s3, 2048  ;;  %s4817_s16 = smov [#allocation16]  }
 0x671   : > { %p4705_p2 = scmp.ne.s32.totalorder %s5753_s3, %s4704_s15  ;;  %s4708_s1 = sshll.u32 %s4817_s16, 4  ;;  %s4709_s1 = int_to_ptr.vmem [resolvable:$false] %s4708_s1 }
 0x672   : > { %s4710_s24 = scalar_lea.vmem %s4709_s1, 4096  ;;  %p4711_p9 = scmp.lt.s32.totalorder %s5753_s3, %s4709_s1 }
 0x673   : > { %v5673_v12 = vld [vmem:[%s5866_s19] ss:$0 sm:$0xff]  ;;  %p4706_p7 = pnand %p4705_p2, %p4971_p3  ;;  %p4712_p12 = scmp.lt.s32.totalorder %s4710_s24, %s4704_s15 }
 0x674   : > { %v5679_v52 = vld [vmem:[%s5867_s26] ss:$0 sm:$0xff] }
 0x675   : > { %s5751_s27 = scalar_lea.hbm %s5868_s28, %s3682_s21  ;;  %p4707_p6 = pneg %p4706_p7 }
 0x676   : > { %p4713_p13 = por %p4712_p12, %p4711_p9 }
 0x678   : > { %p4714_p11 = pnand %p4713_p13, %p4707_p6 }
 0x6ac   : > { %v2987_v29 = vpop.xlane.xlu0 %2986 }
 0x6ad   : > { %v3018_v0 = vmul.f32 0.0078125, %v2987_v29 }
 0x6af   : > { %v3034_v3 = vadd.f32 1e-06, %v3018_v0 }
 0x6b0   : > { %v2989_v30 = vpop.xlane.xlu1 %2988 }
 0x6b1   : > { %4442 = vrsqrt.f32 %v3034_v3  ;;  %v3019_v50 = vmul.f32 0.0078125, %v2989_v30 }
 0x6b3   : > { %v3035_v43 = vadd.f32 1e-06, %v3019_v50 }
 0x6b4   : > { %v2991_v19 = vpop.xlane.xlu0 %2990 }
 0x6b5   : > { %4444 = vrsqrt.f32 %v3035_v43  ;;  %v3020_v18 = vmul.f32 0.0078125, %v2991_v19 }
 0x6b7   : > { %v3036_v61 = vadd.f32 1e-06, %v3020_v18 }
 0x6b8   : > { %v2993_v2 = vpop.xlane.xlu1 %2992 }
 0x6b9   : > { %4446 = vrsqrt.f32 %v3036_v61  ;;  %v3021_v20 = vmul.f32 0.0078125, %v2993_v2 }
 0x6bb   : > { %v3037_v6 = vadd.f32 1e-06, %v3021_v20 }
 0x6bc   : > { %v2995_v9 = vpop.xlane.xlu0 %2994 }
 0x6bd   : > { %4448 = vrsqrt.f32 %v3037_v6  ;;  %v3022_v49 = vmul.f32 0.0078125, %v2995_v9 }
 0x6be   : > { %v4443_v13 = vpop.eup %4442 }
 0x6bf   : > { %v3066_v16 = vmul.f32 %v4443_v13, %v5557_v44  ;;  %v3038_v14 = vadd.f32 1e-06, %v3022_v49 }
 0x6c0   : > { %v2997_v35 = vpop.xlane.xlu1 %2996 }
 0x6c1   : > { %v3089_v47 = vmul.f32 %v5673_v12, %v3066_v16  ;;  %4450 = vrsqrt.f32 %v3038_v14  ;;  %v3023_v22 = vmul.f32 0.0078125, %v2997_v35 }
 0x6c2   : > { %v4445_v45 = vpop.eup %4444 }
 0x6c3   : > { %v3112_v63 = vadd.f32 %v5679_v52, %v3089_v47  ;;  %v3067_v38 = vmul.f32 %v4445_v45, %v5562_v42  ;;  %v3039_v48 = vadd.f32 1e-06, %v3023_v22 }
 0x6c4   : > { %v2999_v5 = vpop.xlane.xlu0 %2998 }
 0x6c5   : > { %3128 = vst [vmem:[%s5685_s8] sm:$0xff] %v3112_v63  ;;  %v3090_v44 = vmul.f32 %v5673_v12, %v3067_v38  ;;  %4452 = vrsqrt.f32 %v3039_v48  ;;  %v3024_v28 = vmul.f32 0.0078125, %v2999_v5 }
 0x6c6   : > { %v4447_v55 = vpop.eup %4446 }
 0x6c7   : > { %v3113_v11 = vadd.f32 %v5679_v52, %v3090_v44  ;;  %v3068_v51 = vmul.f32 %v4447_v55, %v5567_v25  ;;  %v3040_v53 = vadd.f32 1e-06, %v3024_v28 }
 0x6c8   : > { %v3001_v24 = vpop.xlane.xlu1 %3000 }
 0x6c9   : > { %3129 = vst [vmem:[%s5685_s8 + $0x8] sm:$0xff] %v3113_v11  ;;  %v3091_v42 = vmul.f32 %v5673_v12, %v3068_v51  ;;  %4454 = vrsqrt.f32 %v3040_v53  ;;  %v3025_v56 = vmul.f32 0.0078125, %v3001_v24 }
 0x6ca   : > { %v4449_v58 = vpop.eup %4448 }
 0x6cb   : > { %v3114_v46 = vadd.f32 %v5679_v52, %v3091_v42  ;;  %v3069_v40 = vmul.f32 %v4449_v58, %v5572_v8  ;;  %v3041_v41 = vadd.f32 1e-06, %v3025_v56 }
 0x6cc   : > { %v3003_v31 = vpop.xlane.xlu0 %3002 }
 0x6cd   : > { %3130 = vst [vmem:[%s5685_s8 + $0x10] sm:$0xff] %v3114_v46  ;;  %v3092_v62 = vmul.f32 %v5673_v12, %v3069_v40  ;;  %4456 = vrsqrt.f32 %v3041_v41  ;;  %v3026_v25 = vmul.f32 0.0078125, %v3003_v31 }
 0x6ce   : > { %v4451_v59 = vpop.eup %4450 }
 0x6cf   : > { %v3115_v23 = vadd.f32 %v5679_v52, %v3092_v62  ;;  %v3070_v27 = vmul.f32 %v4451_v59, %v5577_v37  ;;  %v3042_v17 = vadd.f32 1e-06, %v3026_v25 }
 0x6d0   : > { %v3005_v10 = vpop.xlane.xlu1 %3004 }
 0x6d1   : > { %3131 = vst [vmem:[%s5685_s8 + $0x18] sm:$0xff] %v3115_v23  ;;  %v3093_v36 = vmul.f32 %v5673_v12, %v3070_v27  ;;  %4458 = vrsqrt.f32 %v3042_v17  ;;  %v3027_v8 = vmul.f32 0.0078125, %v3005_v10 }
 0x6d2   : > { %v4453_v1 = vpop.eup %4452 }
 0x6d3   : > { %v3116_v7 = vadd.f32 %v5679_v52, %v3093_v36  ;;  %v3071_v29 = vmul.f32 %v4453_v1, %v5582_v15  ;;  %v3043_v0 = vadd.f32 1e-06, %v3027_v8 }
 0x6d4   : > { %v3007_v3 = vpop.xlane.xlu0 %3006 }
 0x6d5   : > { %3132 = vst [vmem:[%s5685_s8 + $0x20] sm:$0xff] %v3116_v7  ;;  %v3094_v30 = vmul.f32 %v5673_v12, %v3071_v29  ;;  %4460 = vrsqrt.f32 %v3043_v0  ;;  %v3028_v37 = vmul.f32 0.0078125, %v3007_v3 }
 0x6d6   : > { %v4455_v50 = vpop.eup %4454 }
 0x6d7   : > { %v3117_v43 = vadd.f32 %v5679_v52, %v3094_v30  ;;  %v3072_v19 = vmul.f32 %v4455_v50, %v5587_v21  ;;  %v3044_v18 = vadd.f32 1e-06, %v3028_v37 }
 0x6d8   : > { %v3009_v61 = vpop.xlane.xlu1 %3008 }
 0x6d9   : > { %3133 = vst [vmem:[%s5685_s8 + $0x28] sm:$0xff] %v3117_v43  ;;  %v3095_v2 = vmul.f32 %v5673_v12, %v3072_v19  ;;  %4462 = vrsqrt.f32 %v3044_v18  ;;  %v3029_v15 = vmul.f32 0.0078125, %v3009_v61 }
 0x6da   : > { %v4457_v20 = vpop.eup %4456 }
 0x6db   : > { %v3118_v6 = vadd.f32 %v5679_v52, %v3095_v2  ;;  %v3073_v9 = vmul.f32 %v4457_v20, %v5592_v39  ;;  %v3045_v49 = vadd.f32 1e-06, %v3029_v15 }
 0x6dc   : > { %v3011_v13 = vpop.xlane.xlu0 %3010 }
 0x6dd   : > { %3134 = vst [vmem:[%s5685_s8 + $0x30] sm:$0xff] %v3118_v6  ;;  %v3096_v16 = vmul.f32 %v5673_v12, %v3073_v9  ;;  %4464 = vrsqrt.f32 %v3045_v49  ;;  %v3030_v21 = vmul.f32 0.0078125, %v3011_v13 }
 0x6de   : > { %v4459_v14 = vpop.eup %4458 }
 0x6df   : > { %v3119_v35 = vadd.f32 %v5679_v52, %v3096_v16  ;;  %v3074_v47 = vmul.f32 %v4459_v14, %v5597_v34  ;;  %v3046_v22 = vadd.f32 1e-06, %v3030_v21 }
 0x6e0   : > { %v3013_v45 = vpop.xlane.xlu1 %3012 }
 0x6e1   : > { %3135 = vst [vmem:[%s5685_s8 + $0x38] sm:$0xff] %v3119_v35  ;;  %v3097_v63 = vmul.f32 %v5673_v12, %v3074_v47  ;;  %4466 = vrsqrt.f32 %v3046_v22  ;;  %v3031_v39 = vmul.f32 0.0078125, %v3013_v45 }
 0x6e2   : > { %v4461_v38 = vpop.eup %4460 }
 0x6e3   : > { %v3120_v48 = vadd.f32 %v5679_v52, %v3097_v63  ;;  %v3075_v5 = vmul.f32 %v4461_v38, %v5602_v4  ;;  %v3047_v44 = vadd.f32 1e-06, %v3031_v39 }
 0x6e4   : > { %v3015_v28 = vpop.xlane.xlu0 %3014 }
 0x6e5   : > { %3136 = vst [vmem:[%s5685_s8 + $0x40] sm:$0xff] %v3120_v48  ;;  %v3098_v55 = vmul.f32 %v5673_v12, %v3075_v5  ;;  %4468 = vrsqrt.f32 %v3047_v44  ;;  %v3032_v34 = vmul.f32 0.0078125, %v3015_v28 }
 0x6e6   : > { %v4463_v11 = vpop.eup %4462 }
 0x6e7   : > { %v3121_v51 = vadd.f32 %v5679_v52, %v3098_v55  ;;  %v3076_v53 = vmul.f32 %v4463_v11, %v5607_v54  ;;  %v3048_v24 = vadd.f32 1e-06, %v3032_v34 }
 0x6e8   : > { %v3017_v42 = vpop.xlane.xlu1 %3016 }
 0x6e9   : > { %3137 = vst [vmem:[%s5685_s8 + $0x48] sm:$0xff] %v3121_v51  ;;  %v3099_v56 = vmul.f32 %v5673_v12, %v3076_v53  ;;  %4470 = vrsqrt.f32 %v3048_v24  ;;  %v3033_v4 = vmul.f32 0.0078125, %v3017_v42 }
 0x6ea   : > { %v4465_v58 = vpop.eup %4464 }
 0x6eb   : > { %v3122_v46 = vadd.f32 %v5679_v52, %v3099_v56  ;;  %v3077_v40 = vmul.f32 %v4465_v58, %v5612_v32  ;;  %v3049_v41 = vadd.f32 1e-06, %v3033_v4 }
 0x6ed   : > { %3138 = vst [vmem:[%s5685_s8 + $0x50] sm:$0xff] %v3122_v46  ;;  %v3100_v31 = vmul.f32 %v5673_v12, %v3077_v40  ;;  %4472 = vrsqrt.f32 %v3049_v41 }
 0x6ee   : > { %v4467_v54 = vpop.eup %4466 }
 0x6ef   : > { %v3123_v62 = vadd.f32 %v5679_v52, %v3100_v31  ;;  %v3078_v25 = vmul.f32 %v4467_v54, %v5617_v60 }
 0x6f1   : > { %3139 = vst [vmem:[%s5685_s8 + $0x58] sm:$0xff] %v3123_v62  ;;  %v3101_v59 = vmul.f32 %v5673_v12, %v3078_v25 }
 0x6f2   : > { %v4469_v23 = vpop.eup %4468 }
 0x6f3   : > { %v3124_v32 = vadd.f32 %v5679_v52, %v3101_v59  ;;  %v3079_v27 = vmul.f32 %v4469_v23, %v5622_v26 }
 0x6f5   : > { %3140 = vst [vmem:[%s5685_s8 + $0x60] sm:$0xff] %v3124_v32  ;;  %v3102_v17 = vmul.f32 %v5673_v12, %v3079_v27 }
 0x6f6   : > { %v4471_v10 = vpop.eup %4470 }
 0x6f7   : > { %v3125_v36 = vadd.f32 %v5679_v52, %v3102_v17  ;;  %v3080_v60 = vmul.f32 %v4471_v10, %v5627_v33 }
 0x6f9   : > { %3141 = vst [vmem:[%s5685_s8 + $0x68] sm:$0xff] %v3125_v36  ;;  %v3103_v8 = vmul.f32 %v5673_v12, %v3080_v60 }
 0x6fa   : > { %v4473_v1 = vpop.eup %4472 }
 0x6fb   : > { %v3126_v7 = vadd.f32 %v5679_v52, %v3103_v8  ;;  %v3081_v29 = vmul.f32 %v4473_v1, %v5632_v57 }
 0x6fd   : > { %3142 = vst [vmem:[%s5685_s8 + $0x70] sm:$0xff] %v3126_v7  ;;  %v3104_v26 = vmul.f32 %v5673_v12, %v3081_v29 }
 0x6ff   : > { %v3127_v33 = vadd.f32 %v5679_v52, %v3104_v26 }
 0x701   : > { %3143 = vst [vmem:[%s5685_s8 + $0x78] sm:$0xff] %v3127_v33 }
 0x702   : > { %4717 = shalt.err (!%p4714_p11)
}
 0x703   : > { %s4718_s21 = scalar_lea.hbm %s5751_s27, 2048  ;;  %s4722_s9 = scalar_lea.hbm %s5868_s28, 4096 }
 0x704   : > { %p4719_p0 = scmp.ne.s32.totalorder %s5751_s27, %s4718_s21  ;;  %p4723_p10 = scmp.lt.s32.totalorder %s5751_s27, %s5868_s28 }
 0x705   : > { %p4724_p5 = scmp.lt.s32.totalorder %s4722_s9, %s4718_s21 }
 0x706   : > { %p4720_p1 = pnand %p4719_p0, %p4971_p3 }
 0x707   : > { %p4725_p4 = por %p4724_p5, %p4723_p10 }
 0x708   : > { %p4721_p8 = pneg %p4720_p1 }
 0x70a   : > { %p4726_p2 = pnand %p4725_p4, %p4721_p8 }
 0x70c   : > { %4729 = shalt.err (!%p4726_p2)
}
 0x70d   : > { %s4818_s29 = smov 128   ;;  %s4819_s18 = smov 8  }
 0x70e   : > { %4073 = dma.vmem_to_hbm [thread:$0]  (%p4971_p3), %s5753_s3, 2048, %s5751_s27, %s3145_s5, %s4818_s29, %s4818_s29, %s4819_s18  }
 0x70f PF: > { %s5869_s19 = sld [smem:[#allocation25_spill]] }
 0x710   : > { %s5870_s12 = sld [smem:[#allocation28_spill]] }
 0x711   : > { %s5871_s11 = sld [smem:[#allocation27_spill]] }
 0x715   : > { %s3198_s26 = sand.u32 1, %s5869_s19  }
 0x716   : > { %p5872_p7 = scmp.ne.s32.totalorder %s5870_s12, 0  ;;  %s3199_s8 = scalar_lea.sflag [#allocation6], %s3198_s26 }
 0x717   : > { %p5873_p6 = scmp.ge.s32.totalorder %s5871_s11, 2 }
 0x719   : > { %p4101_p9 = pnand %p5873_p6, %p5872_p7 }
 0x71b   : > { %p4102_p12 = pneg %p4101_p9 }
 0x71d   : > { %4771 = dma.done.wait (%p4102_p12), %s3199_s8, 2048  }
 0x71e   : > { %4773 = vsyncadd (%p4102_p12), %s3199_s8, 4294965248  ;;  %s3208_s10 = scalar_lea.sflag [#allocation18], %s3198_s26 }
 0x71f   : > { %4775 = dma.done.wait (%p4102_p12), %s3208_s10, 2048  }
 0x720   : > { %4777 = vsyncadd (%p4102_p12), %s3208_s10, 4294965248  ;;  %s35_s18 = sadd.s32 1, %s5871_s11   ;;  %s5874_s20 = sld [smem:[#allocation26_spill]] }
 0x721   : > { %p32_p13 = scmp.ge.s32.totalorder %s35_s18, 4   ;;  %s5875_s15 = sld [smem:[#allocation30_spill]] }
 0x722   : > { %s5876_s2 = sld [smem:[#allocation29_spill]]  ;;  %s5877_s13 = smov %s4784_s14 }
 0x723   : > { %s5879_s16 = smov %s4796_s17 }
 0x724   :  { %34 = sbr.rel (!%p32_p13) target bundleno = 21 (0x15), region = 163 }
 0x726   : > { %s5878_s14 = smov %s5874_s20 }
 0x728   : > { %s5880_s17 = smov %s5876_s2 }
 0x729   :  { %3213 = vsyncpa [#allocation5], 1 }
 0x72a   :  { %3215 = vsyncpa [#allocation5 + $0x1], 1 }
 0x72b   :  { %3216 = vsyncpa [#allocation8], 1 }
 0x72c   :  { %3218 = vsyncpa [#allocation8 + $0x1], 1 }
 0x72d   :  { %3219 = vsyncpa [#allocation11], 1 }
 0x72e   :  { %3220 = vsyncpa [#allocation14], 1 }
 0x72f   :  { %3221 = vsyncpa [#allocation6], 1 }
 0x730   :  { %3223 = vsyncpa [#allocation6 + $0x1], 1 }
 0x731   :  { %3224 = vsyncpa [#allocation18], 1 }
 0x732   :  { %3226 = vsyncpa [#allocation18 + $0x1], 1 }

</bundles_post_ra>
